<compile_context>
chip_gen: v7x
topology: tpu7x:2x2x1
jax: 0.10.0
libtpu: 0.0.40
codegen_flags: <defaults>
</compile_context>

<pallas_src>
import functools

import jax
import jax.numpy as jnp
from jax import lax
from jax.experimental import pallas as pl
from jax.experimental.pallas import tpu as pltpu


def _tcn_kernel(x_ref, w_in_ref, b_in_ref, wd_ref, bd_ref, w1_ref, b1_ref,
                w_out_ref, b_out_ref, o_ref, h_ref, lhs_ref,
                *, num_layers, seq_len):
    l = pl.program_id(1)                # layer step (innermost, "arbitrary")
    T = seq_len
    rows, H = h_ref.shape

    # ---- input 1x1 conv: first layer step of each row tile only ------------
    @pl.when(l == 0)
    def _():
        h_ref[...] = (jnp.dot(x_ref[...], w_in_ref[...],
                              preferred_element_type=jnp.float32)
                      + b_in_ref[...])

    h = h_ref[...]                      # residual stream, f32

    # causal time index within each folded sequence, hoisted to (rows, 1)
    local_t = lax.broadcasted_iota(jnp.int32, (rows, 1), 0) % T

    # Fused dilated-conv LHS chunk layout: [shift 2d | shift d | shift 0],
    # matching the (3H, H) stacked weight rows.  shift(h, s)[b*T+t] =
    # h[b*T+t-s] for t >= s else 0: pltpu.roll is a cheap XLU sublane rotate;
    # the (local_t >= s) mask applies the causal zero-pad AND kills any roll
    # bleed across sequence boundaries.  Select+cast is fused per chunk and
    # stored straight into the bf16 scratch (no f32 concat slab).
    lhs_ref[:, 2 * H:3 * H] = h.astype(jnp.bfloat16)   # shift-0 tap, all layers

    for lyr in range(num_layers):       # static shifts per pl.when branch
        d = 2 ** lyr

        @pl.when(l == lyr)
        def _(d=d):
            for c, s in enumerate((2 * d, d)):
                if s < T:
                    r = pltpu.roll(h, shift=s, axis=0)
                    lhs_ref[:, c * H:(c + 1) * H] = jnp.where(
                        local_t >= s, r, 0.0).astype(jnp.bfloat16)
                else:
                    # tap reaches before the start of every sequence -> zeros
                    lhs_ref[:, c * H:(c + 1) * H] = jnp.zeros(
                        (rows, H), jnp.bfloat16)

    # fused dilated conv: one K = 3H MXU matmul (tap accumulation in the MXU)
    y = (jnp.dot(lhs_ref[...], wd_ref[0], preferred_element_type=jnp.float32)
         + bd_ref[0])
    y = jnp.maximum(y, 0.0)             # ReLU
    z = (jnp.dot(y.astype(jnp.bfloat16), w1_ref[0],
                 preferred_element_type=jnp.float32) + b1_ref[0])
    h_new = h + z                       # dropout == identity at inference
    h_ref[...] = h_new

    # ---- output 1x1 conv: last layer step only (lane-dense padded store) ---
    @pl.when(l == num_layers - 1)
    def _():
        o_ref[...] = (jnp.dot(h_new.astype(jnp.bfloat16), w_out_ref[...],
                              preferred_element_type=jnp.float32)
                      + b_out_ref[...]).astype(o_ref.dtype)


def _pick_rows_per_tile(B, T, target_rows=1024):
    """Batch-aligned row tile: whole sequences per tile, rows % 8 == 0."""
    BT = B * T
    divisors = [s for s in range(1, B + 1) if B % s == 0 and (s * T) % 8 == 0]
    if not divisors:
        return BT                       # single full-extent block (always legal)
    for s in divisors:
        if s * T >= min(target_rows, BT):
            return s * T
    return divisors[-1] * T


def tcn_prediction(x, params, num_layers):
    B, T, F = x.shape
    H = params["w_in"].shape[1]
    C = params["w_out"].shape[1]
    BT = B * T
    Fp = ((F + 127) // 128) * 128       # lane-aligned K for the first matmul
    Cp = ((C + 127) // 128) * 128       # lane-dense padded classes

    rows = _pick_rows_per_tile(B, T)
    n_tiles = BT // rows

    # wrapper-side packing (layout plumbing): bf16 weights/activations halve
    # HBM traffic and double MXU rate on v6e/v7x; dots still accumulate f32.
    x2 = jnp.pad(x.reshape(BT, F).astype(jnp.bfloat16), ((0, 0), (0, Fp - F)))
    w_in = jnp.pad(params["w_in"], ((0, Fp - F), (0, 0))).astype(jnp.bfloat16)
    b_in = params["b_in"]
    # taps j=0,1,2 (shifts 2d, d, 0) stacked along K -> one fused (3H, H) matmul
    wd = params["wd"].reshape(num_layers, 3 * H, H).astype(jnp.bfloat16)
    bd = params["bd"]
    w1 = params["w1"].astype(jnp.bfloat16)
    b1 = params["b1"]
    w_out = jnp.pad(params["w_out"], ((0, 0), (0, Cp - C))).astype(jnp.bfloat16)
    b_out = jnp.pad(params["b_out"], ((0, 0), (0, Cp - C)))

    kernel = functools.partial(_tcn_kernel, num_layers=num_layers, seq_len=T)

    out = pl.pallas_call(
        kernel,
        out_shape=jax.ShapeDtypeStruct((BT, Cp), jnp.float32),
        grid=(n_tiles, num_layers),
        in_specs=[
            pl.BlockSpec((rows, Fp), lambda i, l: (i, 0)),        # x tile (resident over l)
            pl.BlockSpec((Fp, H), lambda i, l: (0, 0)),           # w_in
            pl.BlockSpec((1, H), lambda i, l: (0, 0)),            # b_in
            pl.BlockSpec((1, 3 * H, H), lambda i, l: (l, 0, 0)),  # per-layer wd (pipelined)
            pl.BlockSpec((1, 1, H), lambda i, l: (l, 0, 0)),      # per-layer bd
            pl.BlockSpec((1, H, H), lambda i, l: (l, 0, 0)),      # per-layer w1
            pl.BlockSpec((1, 1, H), lambda i, l: (l, 0, 0)),      # per-layer b1
            pl.BlockSpec((H, Cp), lambda i, l: (0, 0)),           # w_out
            pl.BlockSpec((1, Cp), lambda i, l: (0, 0)),           # b_out
        ],
        out_specs=pl.BlockSpec((rows, Cp), lambda i, l: (i, 0)),
        scratch_shapes=[
            pltpu.VMEM((rows, H), jnp.float32),       # residual stream h
            pltpu.VMEM((rows, 3 * H), jnp.bfloat16),  # fused dilated-conv LHS
        ],
        compiler_params=pltpu.CompilerParams(
            dimension_semantics=("parallel", "arbitrary"),
            vmem_limit_bytes=48 * 1024 * 1024,
        ),
    )(x2, w_in, b_in, wd, bd, w1, b1, w_out, b_out)
    return out[:, :C].reshape(B, T, C).astype(x.dtype)


def init_params(key, feat_dim, hidden, num_classes, num_layers):
    ks = jax.random.split(key, 8)
    s = 0.05
    return dict(
        w_in=jax.random.normal(ks[0], (feat_dim, hidden), jnp.float32) * s,
        b_in=jax.random.normal(ks[1], (1, hidden), jnp.float32) * s,
        wd=jax.random.normal(ks[2], (num_layers, 3, hidden, hidden), jnp.float32) * s,
        bd=jax.random.normal(ks[3], (num_layers, 1, hidden), jnp.float32) * s,
        w1=jax.random.normal(ks[4], (num_layers, hidden, hidden), jnp.float32) * s,
        b1=jax.random.normal(ks[5], (num_layers, 1, hidden), jnp.float32) * s,
        w_out=jax.random.normal(ks[6], (hidden, num_classes), jnp.float32) * s,
        b_out=jax.random.normal(ks[7], (1, num_classes), jnp.float32) * s,
    )


def reference(x, params, num_layers):
    # pure-JAX f32 reference mirroring the PyTorch forward (eval mode)
    B, T, _ = x.shape
    h = x @ params["w_in"] + params["b_in"]

    def sh(v, s):
        if s == 0:
            return v
        if s >= T:
            return jnp.zeros_like(v)
        pad = jnp.zeros((B, s, v.shape[-1]), v.dtype)
        return jnp.concatenate([pad, v[:, : T - s]], axis=1)

    for l in range(num_layers):
        d = 2 ** l
        y = (sh(h, 2 * d) @ params["wd"][l, 0]
             + sh(h, d) @ params["wd"][l, 1]
             + h @ params["wd"][l, 2]
             + params["bd"][l])
        y = jnp.maximum(y, 0.0)
        h = h + (y @ params["w1"][l] + params["b1"][l])
    return h @ params["w_out"] + params["b_out"]


if __name__ == "__main__":
    B, T = 2, 16
    feat_dim, num_classes = 16, 8
    hidden = 256          # hardcoded in SingleStageTCN(feat_dim, 256, ...)
    num_layers = 5        # TCNPrediction default

    key = jax.random.PRNGKey(0)
    kx, kp = jax.random.split(key)
    x = jax.random.normal(kx, (B, T, feat_dim), jnp.float32)
    params = init_params(kp, feat_dim, hidden, num_classes, num_layers)

    out = jax.block_until_ready(tcn_prediction(x, params, num_layers))

    ref = reference(x, params, num_layers)
    assert out.shape == (B, T, num_classes)
    # bf16 weight/activation rounding (deliberate perf optimization) gives
    # ~1e-2-level deviation from the f32 reference; accumulation is still f32.
    max_err = float(jnp.max(jnp.abs(out - ref)))
    assert jnp.allclose(out, ref, atol=5e-2, rtol=5e-2), max_err

    print("KERNEL_OK")
</pallas_src>

<mosaic_0001>
module attributes {stable_mosaic.version = 11 : i64} {
  func.func @_tcn_kernel(%arg0: i32, %arg1: i32, %arg2: memref<32x128xbf16, #tpu.memory_space<vmem>>, %arg3: memref<128x256xbf16, #tpu.memory_space<vmem>>, %arg4: memref<1x256xf32, #tpu.memory_space<vmem>>, %arg5: memref<1x768x256xbf16, #tpu.memory_space<vmem>>, %arg6: memref<1x1x256xf32, #tpu.memory_space<vmem>>, %arg7: memref<1x256x256xbf16, #tpu.memory_space<vmem>>, %arg8: memref<1x1x256xf32, #tpu.memory_space<vmem>>, %arg9: memref<256x128xbf16, #tpu.memory_space<vmem>>, %arg10: memref<1x128xf32, #tpu.memory_space<vmem>>, %arg11: memref<32x128xf32, #tpu.memory_space<vmem>>, %arg12: memref<32x256xf32, #tpu.memory_space<vmem>>, %arg13: memref<32x768xbf16, #tpu.memory_space<vmem>>) attributes {dimension_semantics = [#tpu.dimension_semantics<parallel>, #tpu.dimension_semantics<arbitrary>], iteration_bounds = array<i64: 1, 5>, scalar_prefetch = 0 : i64, scratch_operands = 2 : i64, tpu.core_type = #tpu.core_type<tc>, window_params = [{transform_indices = @transform_0, window_bounds = array<i64: 32, 128>}, {pipeline_mode = #tpu.pipeline_mode<synchronous>, transform_indices = @transform_1, window_bounds = array<i64: 128, 256>}, {pipeline_mode = #tpu.pipeline_mode<synchronous>, transform_indices = @transform_2, window_bounds = array<i64: 1, 256>}, {transform_indices = @transform_3, window_bounds = array<i64: 1, 768, 256>}, {transform_indices = @transform_4, window_bounds = array<i64: 1, 1, 256>}, {transform_indices = @transform_5, window_bounds = array<i64: 1, 256, 256>}, {transform_indices = @transform_6, window_bounds = array<i64: 1, 1, 256>}, {pipeline_mode = #tpu.pipeline_mode<synchronous>, transform_indices = @transform_7, window_bounds = array<i64: 256, 128>}, {pipeline_mode = #tpu.pipeline_mode<synchronous>, transform_indices = @transform_8, window_bounds = array<i64: 1, 128>}, {transform_indices = @transform_9, window_bounds = array<i64: 32, 128>}]} {
    %c0_i32 = arith.constant 0 : i32
    %0 = arith.cmpi eq, %arg1, %c0_i32 : i32
    %1 = arith.extui %0 : i1 to i32
    %c0_i32_0 = arith.constant 0 : i32
    %2 = arith.cmpi ne, %1, %c0_i32_0 : i32
    scf.if %2 {
      %c0_34 = arith.constant 0 : index
      %c0_35 = arith.constant 0 : index
      %61 = vector.load %arg2[%c0_34, %c0_35] : memref<32x128xbf16, #tpu.memory_space<vmem>>, vector<32x128xbf16>
      %c0_36 = arith.constant 0 : index
      %c0_37 = arith.constant 0 : index
      %62 = vector.load %arg3[%c0_36, %c0_37] : memref<128x256xbf16, #tpu.memory_space<vmem>>, vector<128x256xbf16>
      %cst_38 = arith.constant dense<0.000000e+00> : vector<32x256xf32>
      %63 = tpu.matmul %61, %62, %cst_38 {dimension_numbers = #tpu.dot_dimension_numbers<[1], [0], [0], [1], [0, 0, 1, 1], [], []>} : vector<32x128xbf16>, vector<128x256xbf16>, vector<32x256xf32> -> vector<32x256xf32>
      %c0_39 = arith.constant 0 : index
      %c0_40 = arith.constant 0 : index
      %64 = vector.load %arg4[%c0_39, %c0_40] : memref<1x256xf32, #tpu.memory_space<vmem>>, vector<1x256xf32>
      %65 = vector.broadcast %64 : vector<1x256xf32> to vector<32x256xf32>
      %66 = arith.addf %63, %65 : vector<32x256xf32>
      %c0_41 = arith.constant 0 : index
      %c0_42 = arith.constant 0 : index
      %67 = vector.load %arg12[%c0_41, %c0_42] : memref<32x256xf32, #tpu.memory_space<vmem>>, vector<32x256xf32>
      tpu.vector_store %arg12[%c0_41, %c0_42], %66 {strides = array<i32>} : memref<32x256xf32, #tpu.memory_space<vmem>>, vector<32x256xf32>,
    } else {
    }
    %c0 = arith.constant 0 : index
    %c0_1 = arith.constant 0 : index
    %3 = vector.load %arg12[%c0, %c0_1] : memref<32x256xf32, #tpu.memory_space<vmem>>, vector<32x256xf32>
    %4 = tpu.iota {dimensions = array<i32: 0>} : vector<32x1xi32>
    %c16_i32 = arith.constant 16 : i32
    %c0_i32_2 = arith.constant 0 : i32
    %5 = arith.cmpi eq, %c16_i32, %c0_i32_2 : i32
    %c1_i32 = arith.constant 1 : i32
    %6 = arith.select %5, %c1_i32, %c16_i32 : i32
    %7 = vector.broadcast %6 : i32 to vector<32x1xi32>
    %8 = arith.remsi %4, %7 : vector<32x1xi32>
    %c0_i32_3 = arith.constant 0 : i32
    %9 = vector.broadcast %c0_i32_3 : i32 to vector<32x1xi32>
    %10 = arith.cmpi ne, %8, %9 : vector<32x1xi32>
    %c0_i32_4 = arith.constant 0 : i32
    %11 = vector.broadcast %c0_i32_4 : i32 to vector<32x1xi32>
    %12 = arith.cmpi slt, %8, %11 : vector<32x1xi32>
    %c0_i32_5 = arith.constant 0 : i32
    %13 = arith.cmpi slt, %6, %c0_i32_5 : i32
    %14 = vector.broadcast %13 : i1 to vector<32x1xi1>
    %15 = vector.broadcast %14 : vector<32x1xi1> to vector<32x1xi1>
    %16 = arith.xori %12, %15 : vector<32x1xi1>
    %17 = arith.andi %16, %10 : vector<32x1xi1>
    %18 = vector.broadcast %6 : i32 to vector<32x1xi32>
    %19 = arith.addi %8, %18 : vector<32x1xi32>
    %20 = arith.select %17, %19, %8 : vector<32x1xi1>, vector<32x1xi32>
    %21 = arith.truncf %3 : vector<32x256xf32> to vector<32x256xbf16>
    %c0_6 = arith.constant 0 : index
    %c512 = arith.constant 512 : index
    %22 = vector.load %arg13[%c0_6, %c512] : memref<32x768xbf16, #tpu.memory_space<vmem>>, vector<32x256xbf16>
    tpu.vector_store %arg13[%c0_6, %c512], %21 {strides = array<i32>} : memref<32x768xbf16, #tpu.memory_space<vmem>>, vector<32x256xbf16>,
    %c0_i32_7 = arith.constant 0 : i32
    %23 = arith.cmpi eq, %arg1, %c0_i32_7 : i32
    %24 = arith.extui %23 : i1 to i32
    %c0_i32_8 = arith.constant 0 : i32
    %25 = arith.cmpi ne, %24, %c0_i32_8 : i32
    scf.if %25 {
      %c2_i32_34 = arith.constant 2 : i32
      %61 = tpu.dynamic_rotate %3 by %c2_i32_34 dim 0 : vector<32x256xf32>, i32 -> vector<32x256xf32>
      %c2_i32_35 = arith.constant 2 : i32
      %62 = vector.broadcast %c2_i32_35 : i32 to vector<32x1xi32>
      %63 = arith.cmpi sge, %20, %62 : vector<32x1xi32>
      %cst_36 = arith.constant 0.000000e+00 : f32
      %64 = vector.shape_cast %63 : vector<32x1xi1> to vector<32x1xi1>
      %65 = vector.broadcast %64 : vector<32x1xi1> to vector<32x256xi1>
      %66 = vector.broadcast %cst_36 : f32 to vector<32x256xf32>
      %67 = arith.select %65, %61, %66 : vector<32x256xi1>, vector<32x256xf32>
      %68 = arith.truncf %67 : vector<32x256xf32> to vector<32x256xbf16>
      %c0_37 = arith.constant 0 : index
      %c0_38 = arith.constant 0 : index
      %69 = vector.load %arg13[%c0_37, %c0_38] : memref<32x768xbf16, #tpu.memory_space<vmem>>, vector<32x256xbf16>
      tpu.vector_store %arg13[%c0_37, %c0_38], %68 {strides = array<i32>} : memref<32x768xbf16, #tpu.memory_space<vmem>>, vector<32x256xbf16>,
      %c1_i32_39 = arith.constant 1 : i32
      %70 = tpu.dynamic_rotate %3 by %c1_i32_39 dim 0 : vector<32x256xf32>, i32 -> vector<32x256xf32>
      %c1_i32_40 = arith.constant 1 : i32
      %71 = vector.broadcast %c1_i32_40 : i32 to vector<32x1xi32>
      %72 = arith.cmpi sge, %20, %71 : vector<32x1xi32>
      %cst_41 = arith.constant 0.000000e+00 : f32
      %73 = vector.shape_cast %72 : vector<32x1xi1> to vector<32x1xi1>
      %74 = vector.broadcast %73 : vector<32x1xi1> to vector<32x256xi1>
      %75 = vector.broadcast %cst_41 : f32 to vector<32x256xf32>
      %76 = arith.select %74, %70, %75 : vector<32x256xi1>, vector<32x256xf32>
      %77 = arith.truncf %76 : vector<32x256xf32> to vector<32x256xbf16>
      %c0_42 = arith.constant 0 : index
      %c256 = arith.constant 256 : index
      %78 = vector.load %arg13[%c0_42, %c256] : memref<32x768xbf16, #tpu.memory_space<vmem>>, vector<32x256xbf16>
      tpu.vector_store %arg13[%c0_42, %c256], %77 {strides = array<i32>} : memref<32x768xbf16, #tpu.memory_space<vmem>>, vector<32x256xbf16>,
    } else {
    }
    %c1_i32_9 = arith.constant 1 : i32
    %26 = arith.cmpi eq, %arg1, %c1_i32_9 : i32
    %27 = arith.extui %26 : i1 to i32
    %c0_i32_10 = arith.constant 0 : i32
    %28 = arith.cmpi ne, %27, %c0_i32_10 : i32
    scf.if %28 {
      %c4_i32_34 = arith.constant 4 : i32
      %61 = tpu.dynamic_rotate %3 by %c4_i32_34 dim 0 : vector<32x256xf32>, i32 -> vector<32x256xf32>
      %c4_i32_35 = arith.constant 4 : i32
      %62 = vector.broadcast %c4_i32_35 : i32 to vector<32x1xi32>
      %63 = arith.cmpi sge, %20, %62 : vector<32x1xi32>
      %cst_36 = arith.constant 0.000000e+00 : f32
      %64 = vector.shape_cast %63 : vector<32x1xi1> to vector<32x1xi1>
      %65 = vector.broadcast %64 : vector<32x1xi1> to vector<32x256xi1>
      %66 = vector.broadcast %cst_36 : f32 to vector<32x256xf32>
      %67 = arith.select %65, %61, %66 : vector<32x256xi1>, vector<32x256xf32>
      %68 = arith.truncf %67 : vector<32x256xf32> to vector<32x256xbf16>
      %c0_37 = arith.constant 0 : index
      %c0_38 = arith.constant 0 : index
      %69 = vector.load %arg13[%c0_37, %c0_38] : memref<32x768xbf16, #tpu.memory_space<vmem>>, vector<32x256xbf16>
      tpu.vector_store %arg13[%c0_37, %c0_38], %68 {strides = array<i32>} : memref<32x768xbf16, #tpu.memory_space<vmem>>, vector<32x256xbf16>,
      %c2_i32_39 = arith.constant 2 : i32
      %70 = tpu.dynamic_rotate %3 by %c2_i32_39 dim 0 : vector<32x256xf32>, i32 -> vector<32x256xf32>
      %c2_i32_40 = arith.constant 2 : i32
      %71 = vector.broadcast %c2_i32_40 : i32 to vector<32x1xi32>
      %72 = arith.cmpi sge, %20, %71 : vector<32x1xi32>
      %cst_41 = arith.constant 0.000000e+00 : f32
      %73 = vector.shape_cast %72 : vector<32x1xi1> to vector<32x1xi1>
      %74 = vector.broadcast %73 : vector<32x1xi1> to vector<32x256xi1>
      %75 = vector.broadcast %cst_41 : f32 to vector<32x256xf32>
      %76 = arith.select %74, %70, %75 : vector<32x256xi1>, vector<32x256xf32>
      %77 = arith.truncf %76 : vector<32x256xf32> to vector<32x256xbf16>
      %c0_42 = arith.constant 0 : index
      %c256 = arith.constant 256 : index
      %78 = vector.load %arg13[%c0_42, %c256] : memref<32x768xbf16, #tpu.memory_space<vmem>>, vector<32x256xbf16>
      tpu.vector_store %arg13[%c0_42, %c256], %77 {strides = array<i32>} : memref<32x768xbf16, #tpu.memory_space<vmem>>, vector<32x256xbf16>,
    } else {
    }
    %c2_i32 = arith.constant 2 : i32
    %29 = arith.cmpi eq, %arg1, %c2_i32 : i32
    %30 = arith.extui %29 : i1 to i32
    %c0_i32_11 = arith.constant 0 : i32
    %31 = arith.cmpi ne, %30, %c0_i32_11 : i32
    scf.if %31 {
      %c8_i32 = arith.constant 8 : i32
      %61 = tpu.dynamic_rotate %3 by %c8_i32 dim 0 : vector<32x256xf32>, i32 -> vector<32x256xf32>
      %c8_i32_34 = arith.constant 8 : i32
      %62 = vector.broadcast %c8_i32_34 : i32 to vector<32x1xi32>
      %63 = arith.cmpi sge, %20, %62 : vector<32x1xi32>
      %cst_35 = arith.constant 0.000000e+00 : f32
      %64 = vector.shape_cast %63 : vector<32x1xi1> to vector<32x1xi1>
      %65 = vector.broadcast %64 : vector<32x1xi1> to vector<32x256xi1>
      %66 = vector.broadcast %cst_35 : f32 to vector<32x256xf32>
      %67 = arith.select %65, %61, %66 : vector<32x256xi1>, vector<32x256xf32>
      %68 = arith.truncf %67 : vector<32x256xf32> to vector<32x256xbf16>
      %c0_36 = arith.constant 0 : index
      %c0_37 = arith.constant 0 : index
      %69 = vector.load %arg13[%c0_36, %c0_37] : memref<32x768xbf16, #tpu.memory_space<vmem>>, vector<32x256xbf16>
      tpu.vector_store %arg13[%c0_36, %c0_37], %68 {strides = array<i32>} : memref<32x768xbf16, #tpu.memory_space<vmem>>, vector<32x256xbf16>,
      %c4_i32_38 = arith.constant 4 : i32
      %70 = tpu.dynamic_rotate %3 by %c4_i32_38 dim 0 : vector<32x256xf32>, i32 -> vector<32x256xf32>
      %c4_i32_39 = arith.constant 4 : i32
      %71 = vector.broadcast %c4_i32_39 : i32 to vector<32x1xi32>
      %72 = arith.cmpi sge, %20, %71 : vector<32x1xi32>
      %cst_40 = arith.constant 0.000000e+00 : f32
      %73 = vector.shape_cast %72 : vector<32x1xi1> to vector<32x1xi1>
      %74 = vector.broadcast %73 : vector<32x1xi1> to vector<32x256xi1>
      %75 = vector.broadcast %cst_40 : f32 to vector<32x256xf32>
      %76 = arith.select %74, %70, %75 : vector<32x256xi1>, vector<32x256xf32>
      %77 = arith.truncf %76 : vector<32x256xf32> to vector<32x256xbf16>
      %c0_41 = arith.constant 0 : index
      %c256 = arith.constant 256 : index
      %78 = vector.load %arg13[%c0_41, %c256] : memref<32x768xbf16, #tpu.memory_space<vmem>>, vector<32x256xbf16>
      tpu.vector_store %arg13[%c0_41, %c256], %77 {strides = array<i32>} : memref<32x768xbf16, #tpu.memory_space<vmem>>, vector<32x256xbf16>,
    } else {
    }
    %c3_i32 = arith.constant 3 : i32
    %32 = arith.cmpi eq, %arg1, %c3_i32 : i32
    %33 = arith.extui %32 : i1 to i32
    %c0_i32_12 = arith.constant 0 : i32
    %34 = arith.cmpi ne, %33, %c0_i32_12 : i32
    scf.if %34 {
      %cst_34 = arith.constant 0.000000e+00 : bf16
      %61 = vector.broadcast %cst_34 : bf16 to vector<32x256xbf16>
      %c0_35 = arith.constant 0 : index
      %c0_36 = arith.constant 0 : index
      %62 = vector.load %arg13[%c0_35, %c0_36] : memref<32x768xbf16, #tpu.memory_space<vmem>>, vector<32x256xbf16>
      tpu.vector_store %arg13[%c0_35, %c0_36], %61 {strides = array<i32>} : memref<32x768xbf16, #tpu.memory_space<vmem>>, vector<32x256xbf16>,
      %c8_i32 = arith.constant 8 : i32
      %63 = tpu.dynamic_rotate %3 by %c8_i32 dim 0 : vector<32x256xf32>, i32 -> vector<32x256xf32>
      %c8_i32_37 = arith.constant 8 : i32
      %64 = vector.broadcast %c8_i32_37 : i32 to vector<32x1xi32>
      %65 = arith.cmpi sge, %20, %64 : vector<32x1xi32>
      %cst_38 = arith.constant 0.000000e+00 : f32
      %66 = vector.shape_cast %65 : vector<32x1xi1> to vector<32x1xi1>
      %67 = vector.broadcast %66 : vector<32x1xi1> to vector<32x256xi1>
      %68 = vector.broadcast %cst_38 : f32 to vector<32x256xf32>
      %69 = arith.select %67, %63, %68 : vector<32x256xi1>, vector<32x256xf32>
      %70 = arith.truncf %69 : vector<32x256xf32> to vector<32x256xbf16>
      %c0_39 = arith.constant 0 : index
      %c256 = arith.constant 256 : index
      %71 = vector.load %arg13[%c0_39, %c256] : memref<32x768xbf16, #tpu.memory_space<vmem>>, vector<32x256xbf16>
      tpu.vector_store %arg13[%c0_39, %c256], %70 {strides = array<i32>} : memref<32x768xbf16, #tpu.memory_space<vmem>>, vector<32x256xbf16>,
    } else {
    }
    %c4_i32 = arith.constant 4 : i32
    %35 = arith.cmpi eq, %arg1, %c4_i32 : i32
    %36 = arith.extui %35 : i1 to i32
    %c0_i32_13 = arith.constant 0 : i32
    %37 = arith.cmpi ne, %36, %c0_i32_13 : i32
    scf.if %37 {
      %cst_34 = arith.constant 0.000000e+00 : bf16
      %61 = vector.broadcast %cst_34 : bf16 to vector<32x256xbf16>
      %c0_35 = arith.constant 0 : index
      %c0_36 = arith.constant 0 : index
      %62 = vector.load %arg13[%c0_35, %c0_36] : memref<32x768xbf16, #tpu.memory_space<vmem>>, vector<32x256xbf16>
      tpu.vector_store %arg13[%c0_35, %c0_36], %61 {strides = array<i32>} : memref<32x768xbf16, #tpu.memory_space<vmem>>, vector<32x256xbf16>,
      %cst_37 = arith.constant 0.000000e+00 : bf16
      %63 = vector.broadcast %cst_37 : bf16 to vector<32x256xbf16>
      %c0_38 = arith.constant 0 : index
      %c256 = arith.constant 256 : index
      %64 = vector.load %arg13[%c0_38, %c256] : memref<32x768xbf16, #tpu.memory_space<vmem>>, vector<32x256xbf16>
      tpu.vector_store %arg13[%c0_38, %c256], %63 {strides = array<i32>} : memref<32x768xbf16, #tpu.memory_space<vmem>>, vector<32x256xbf16>,
    } else {
    }
    %c0_14 = arith.constant 0 : index
    %c0_15 = arith.constant 0 : index
    %38 = vector.load %arg13[%c0_14, %c0_15] : memref<32x768xbf16, #tpu.memory_space<vmem>>, vector<32x768xbf16>
    %c0_16 = arith.constant 0 : index
    %c0_17 = arith.constant 0 : index
    %c0_18 = arith.constant 0 : index
    %39 = vector.load %arg5[%c0_16, %c0_17, %c0_18] : memref<1x768x256xbf16, #tpu.memory_space<vmem>>, vector<1x768x256xbf16>
    %40 = vector.shape_cast %39 : vector<1x768x256xbf16> to vector<768x256xbf16>
    %cst = arith.constant dense<0.000000e+00> : vector<32x256xf32>
    %41 = tpu.matmul %38, %40, %cst {dimension_numbers = #tpu.dot_dimension_numbers<[1], [0], [0], [1], [0, 0, 1, 1], [], []>} : vector<32x768xbf16>, vector<768x256xbf16>, vector<32x256xf32> -> vector<32x256xf32>
    %c0_19 = arith.constant 0 : index
    %c0_20 = arith.constant 0 : index
    %c0_21 = arith.constant 0 : index
    %42 = vector.load %arg6[%c0_19, %c0_20, %c0_21] : memref<1x1x256xf32, #tpu.memory_space<vmem>>, vector<1x1x256xf32>
    %43 = vector.shape_cast %42 : vector<1x1x256xf32> to vector<1x256xf32>
    %44 = vector.broadcast %43 : vector<1x256xf32> to vector<32x256xf32>
    %45 = arith.addf %41, %44 : vector<32x256xf32>
    %cst_22 = arith.constant 0.000000e+00 : f32
    %46 = vector.broadcast %cst_22 : f32 to vector<32x256xf32>
    %47 = arith.maximumf %45, %46 : vector<32x256xf32>
    %48 = arith.truncf %47 : vector<32x256xf32> to vector<32x256xbf16>
    %c0_23 = arith.constant 0 : index
    %c0_24 = arith.constant 0 : index
    %c0_25 = arith.constant 0 : index
    %49 = vector.load %arg7[%c0_23, %c0_24, %c0_25] : memref<1x256x256xbf16, #tpu.memory_space<vmem>>, vector<1x256x256xbf16>
    %50 = vector.shape_cast %49 : vector<1x256x256xbf16> to vector<256x256xbf16>
    %cst_26 = arith.constant dense<0.000000e+00> : vector<32x256xf32>
    %51 = tpu.matmul %48, %50, %cst_26 {dimension_numbers = #tpu.dot_dimension_numbers<[1], [0], [0], [1], [0, 0, 1, 1], [], []>} : vector<32x256xbf16>, vector<256x256xbf16>, vector<32x256xf32> -> vector<32x256xf32>
    %c0_27 = arith.constant 0 : index
    %c0_28 = arith.constant 0 : index
    %c0_29 = arith.constant 0 : index
    %52 = vector.load %arg8[%c0_27, %c0_28, %c0_29] : memref<1x1x256xf32, #tpu.memory_space<vmem>>, vector<1x1x256xf32>
    %53 = vector.shape_cast %52 : vector<1x1x256xf32> to vector<1x256xf32>
    %54 = vector.broadcast %53 : vector<1x256xf32> to vector<32x256xf32>
    %55 = arith.addf %51, %54 : vector<32x256xf32>
    %56 = arith.addf %3, %55 : vector<32x256xf32>
    %c0_30 = arith.constant 0 : index
    %c0_31 = arith.constant 0 : index
    %57 = vector.load %arg12[%c0_30, %c0_31] : memref<32x256xf32, #tpu.memory_space<vmem>>, vector<32x256xf32>
    tpu.vector_store %arg12[%c0_30, %c0_31], %56 {strides = array<i32>} : memref<32x256xf32, #tpu.memory_space<vmem>>, vector<32x256xf32>,
    %c4_i32_32 = arith.constant 4 : i32
    %58 = arith.cmpi eq, %arg1, %c4_i32_32 : i32
    %59 = arith.extui %58 : i1 to i32
    %c0_i32_33 = arith.constant 0 : i32
    %60 = arith.cmpi ne, %59, %c0_i32_33 : i32
    scf.if %60 {
      %61 = arith.truncf %56 : vector<32x256xf32> to vector<32x256xbf16>
      %c0_34 = arith.constant 0 : index
      %c0_35 = arith.constant 0 : index
      %62 = vector.load %arg9[%c0_34, %c0_35] : memref<256x128xbf16, #tpu.memory_space<vmem>>, vector<256x128xbf16>
      %cst_36 = arith.constant dense<0.000000e+00> : vector<32x128xf32>
      %63 = tpu.matmul %61, %62, %cst_36 {dimension_numbers = #tpu.dot_dimension_numbers<[1], [0], [0], [1], [0, 0, 1, 1], [], []>} : vector<32x256xbf16>, vector<256x128xbf16>, vector<32x128xf32> -> vector<32x128xf32>
      %c0_37 = arith.constant 0 : index
      %c0_38 = arith.constant 0 : index
      %64 = vector.load %arg10[%c0_37, %c0_38] : memref<1x128xf32, #tpu.memory_space<vmem>>, vector<1x128xf32>
      %65 = vector.broadcast %64 : vector<1x128xf32> to vector<32x128xf32>
      %66 = arith.addf %63, %65 : vector<32x128xf32>
      %c0_39 = arith.constant 0 : index
      %c0_40 = arith.constant 0 : index
      %67 = vector.load %arg11[%c0_39, %c0_40] : memref<32x128xf32, #tpu.memory_space<vmem>>, vector<32x128xf32>
      tpu.vector_store %arg11[%c0_39, %c0_40], %66 {strides = array<i32>} : memref<32x128xf32, #tpu.memory_space<vmem>>, vector<32x128xf32>,
    } else {
    }
    return
  }
  func.func @transform_0(%arg0: i32, %arg1: i32) -> (i32, i32) {
    %c0_i32 = arith.constant 0 : i32
    %c0_i32_0 = arith.constant 0 : i32
    return %arg0, %c0_i32 : i32, i32
  }
  func.func @transform_1(%arg0: i32, %arg1: i32) -> (i32, i32) {
    %c0_i32 = arith.constant 0 : i32
    %c0_i32_0 = arith.constant 0 : i32
    %c0_i32_1 = arith.constant 0 : i32
    return %c0_i32, %c0_i32_0 : i32, i32
  }
  func.func @transform_2(%arg0: i32, %arg1: i32) -> (i32, i32) {
    %c0_i32 = arith.constant 0 : i32
    %c0_i32_0 = arith.constant 0 : i32
    %c0_i32_1 = arith.constant 0 : i32
    return %c0_i32, %c0_i32_0 : i32, i32
  }
  func.func @transform_3(%arg0: i32, %arg1: i32) -> (i32, i32, i32) {
    %c0_i32 = arith.constant 0 : i32
    %c0_i32_0 = arith.constant 0 : i32
    %c0_i32_1 = arith.constant 0 : i32
    return %arg1, %c0_i32, %c0_i32_0 : i32, i32, i32
  }
  func.func @transform_4(%arg0: i32, %arg1: i32) -> (i32, i32, i32) {
    %c0_i32 = arith.constant 0 : i32
    %c0_i32_0 = arith.constant 0 : i32
    %c0_i32_1 = arith.constant 0 : i32
    return %arg1, %c0_i32, %c0_i32_0 : i32, i32, i32
  }
  func.func @transform_5(%arg0: i32, %arg1: i32) -> (i32, i32, i32) {
    %c0_i32 = arith.constant 0 : i32
    %c0_i32_0 = arith.constant 0 : i32
    %c0_i32_1 = arith.constant 0 : i32
    return %arg1, %c0_i32, %c0_i32_0 : i32, i32, i32
  }
  func.func @transform_6(%arg0: i32, %arg1: i32) -> (i32, i32, i32) {
    %c0_i32 = arith.constant 0 : i32
    %c0_i32_0 = arith.constant 0 : i32
    %c0_i32_1 = arith.constant 0 : i32
    return %arg1, %c0_i32, %c0_i32_0 : i32, i32, i32
  }
  func.func @transform_7(%arg0: i32, %arg1: i32) -> (i32, i32) {
    %c0_i32 = arith.constant 0 : i32
    %c0_i32_0 = arith.constant 0 : i32
    %c0_i32_1 = arith.constant 0 : i32
    return %c0_i32, %c0_i32_0 : i32, i32
  }
  func.func @transform_8(%arg0: i32, %arg1: i32) -> (i32, i32) {
    %c0_i32 = arith.constant 0 : i32
    %c0_i32_0 = arith.constant 0 : i32
    %c0_i32_1 = arith.constant 0 : i32
    return %c0_i32, %c0_i32_0 : i32, i32
  }
  func.func @transform_9(%arg0: i32, %arg1: i32) -> (i32, i32) {
    %c0_i32 = arith.constant 0 : i32
    %c0_i32_0 = arith.constant 0 : i32
    return %arg0, %c0_i32 : i32, i32
  }
}

</mosaic_0001>

<bundles_post_ra>
// kernel: tpu_custom_call.1
= control target key start
LH: loop header
LB: loop body
LE: loop exit
PB: predicated region body
PF: predicated region fallthrough
CT: control target
= control target key end

     0   :  { %s4382_s0 = inlined_call_operand.hbm [shape: bf16[32,128], index: 0, kind: input, shape index: {}]   ;;  %s4383_s1 = inlined_call_operand.hbm [shape: bf16[128,256], index: 1, kind: input, shape index: {}]   ;;  %s4384_s2 = inlined_call_operand.hbm [shape: f32[1,256], index: 2, kind: input, shape index: {}]   ;;  %s4385_s3 = inlined_call_operand.hbm [shape: bf16[5,768,256], index: 3, kind: input, shape index: {}]   ;;  %s4386_s4 = inlined_call_operand.hbm [shape: f32[5,1,256], index: 4, kind: input, shape index: {}]   ;;  %s4387_s5 = inlined_call_operand.hbm [shape: bf16[5,256,256], index: 5, kind: input, shape index: {}]   ;;  %s4388_s6 = inlined_call_operand.hbm [shape: f32[5,1,256], index: 6, kind: input, shape index: {}]   ;;  %s4389_s7 = inlined_call_operand.hbm [shape: bf16[256,128], index: 7, kind: input, shape index: {}]   ;;  %s4390_s8 = inlined_call_operand.hbm [shape: f32[1,128], index: 8, kind: input, shape index: {}]   ;;  %s4391_s9 = inlined_call_operand.hbm [shape: f32[32,128], index: 9, kind: output, shape index: {}]  }
   0x1   :  { %4418 = sst [smem:[#allocation32_spill]] %s4383_s1 }
   0x2   :  { %4419 = sst [smem:[#allocation33_spill]] %s4385_s3 }
   0x3   :  { %4420 = sst [smem:[#allocation34_spill]] %s4387_s5 }
   0x4   :  { %4421 = sst [smem:[#allocation35_spill]] %s4389_s7 }
   0x5   :  { %4422 = sst [smem:[#allocation36_spill]] %s4391_s9 }
   0x6   :  { %14 = vsyncpa [#allocation5], 0 }
   0x7   :  { %15 = vsyncpa [#allocation8], 0 }
   0x8   :  { %16 = vsyncpa [#allocation11], 0 }
   0x9   :  { %18 = vsyncpa [#allocation11 + $0x1], 0 }
   0xa   :  { %19 = vsyncpa [#allocation14], 0 }
   0xb   :  { %21 = vsyncpa [#allocation14 + $0x1], 0 }
   0xc   :  { %22 = vsyncpa [#allocation17], 0 }
   0xd   :  { %23 = vsyncpa [#allocation6], 0  ;;  %s3636_s30 = smov 0   ;;  %s3638_s10 = smov 0  }
   0xe   :  { %s3640_s11 = smov 0   ;;  %s3642_s12 = smov 0  }
   0xf   :  { %s3644_s13 = smov 0   ;;  %s3646_s14 = smov 0  }
  0x10 LB: > { %4423 = sst [smem:[#allocation26_spill]] %s3551_s11  ;;  %s3565_s15 = smov [#allocation7]   ;;  %s3563_s14 = sphi %s3646_s14, %s29_s14   ;;  %s3559_s13 = sphi %s3644_s13, %s4474_s13   ;;  %s3555_s12 = sphi %s3642_s12, %s4473_s12   ;;  %s3551_s11 = sphi %s3640_s11, %s4469_s11   ;;  %s3547_s10 = sphi %s3638_s10, %s4472_s10   ;;  %s3543_s30 = sphi %s3636_s30, %s4471_s30  }
  0x11   : > { %4424 = sst [smem:[#allocation27_spill]] %s3555_s12  ;;  %s314_s16 = sshll.u32 %s3565_s15, 4  ;;  %s3672_s16 = int_to_ptr.vmem [resolvable:$true] %s314_s16 }
  0x12   : > { %4425 = sst [smem:[#allocation28_spill]] %s3563_s14  ;;  %s3667_s17 = sadd.s32 4294967295, %s3563_s14  }
  0x13   : > { %p2544_p0 = scmp.ge.s32.totalorder %s3563_s14, 1  ;;  %p4402_p1 = scmp.eq.s32.totalorder %s3667_s17, 0 }
  0x14   : > { %p286_p2 = scmp.lt.s32.totalorder %s3563_s14, 6  ;;  %s3566_s20 = smov [#allocation16]  }
  0x15   : > { %s338_s21 = sshll.u32 %s3566_s20, 4  ;;  %s4428_s1 = sld [smem:[#allocation32_spill]]  ;;  %s3686_s21 = int_to_ptr.vmem [resolvable:$true] %s338_s21 }
  0x16   : > { %p3674_p3 = pnand %p2544_p0, %p286_p2 }
  0x18   : > { %s4426_s18 = scalar_select %p3674_p3, 1, 0 }
  0x19   : > { %p2866_p4 = pneg %p3674_p3 }
  0x1b   : > { %p3682_p5 = pnand %p2866_p4, %p4402_p1  ;;  %s3207_s24 = scalar_lea.hbm %s4428_s1, 2048 }
  0x1c   : > { %p3208_p6 = scmp.ne.s32.totalorder %s4428_s1, %s3207_s24  ;;  %p3214_p10 = scmp.lt.u32.totalorder %s3207_s24, %s4428_s1 }
  0x1d   : > { %s4427_s19 = scalar_select %p3682_p5, 1, 0 }
  0x1e   : > { %p3696_p7 = pneg %p3682_p5 }
  0x20   : > { %s4429_s27 = scalar_select %p3696_p7, 1, 0 }
  0x21   : > { %p3210_p8 = pnand %p3696_p7, %p3208_p6 }
  0x23   : > { %p3211_p9 = pneg %p3210_p8 }
  0x25   : > { %p3216_p11 = pnand %p3214_p10, %p3211_p9 }
  0x27   : > { %3219 = shalt.err (!%p3216_p11)
}
  0x28   : > { %s3220_s15 = scalar_lea.vmem %s3672_s16, 2048  ;;  %p3228_p2 = scmp.lt.s32.totalorder %s3672_s16, %s3672_s16 }
  0x29   : > { %p3221_p12 = scmp.ne.s32.totalorder %s3672_s16, %s3220_s15  ;;  %p3229_p4 = scmp.lt.s32.totalorder %s3220_s15, %s3220_s15 }
  0x2b   : > { %p3223_p13 = pnand %p3221_p12, %p3696_p7  ;;  %p3230_p6 = por %p3229_p4, %p3228_p2 }
  0x2d   : > { %p3224_p0 = pneg %p3223_p13 }
  0x2f   : > { %p3231_p8 = pnand %p3230_p6, %p3224_p0 }
  0x31   : > { %3234 = shalt.err (!%p3231_p8)
}
  0x32   : > { %s4397_s20 = smov 128   ;;  %s4399_s22 = smov 8  }
  0x33   : > { %2872 = dma.hbm_to_vmem [thread:$0]  (!%p3682_p5), %s4428_s1, 2048, %s3672_s16, [#allocation8], %s4397_s20, %s4397_s20, %s4399_s22  }
  0x34   : > { %s4430_s7 = sld [smem:[#allocation35_spill]] }
  0x3a   : > { %s3235_s28 = scalar_lea.hbm %s4430_s7, 2048 }
  0x3b   : > { %p3236_p9 = scmp.ne.s32.totalorder %s4430_s7, %s3235_s28  ;;  %p3242_p12 = scmp.lt.u32.totalorder %s3235_s28, %s4430_s7 }
  0x3d   : > { %p3238_p10 = pnand %p3236_p9, %p3696_p7 }
  0x3f   : > { %p3239_p11 = pneg %p3238_p10 }
  0x41   : > { %p3244_p13 = pnand %p3242_p12, %p3239_p11 }
  0x43   : > { %3247 = shalt.err (!%p3244_p13)
}
  0x44   : > { %s3248_s16 = scalar_lea.vmem %s3686_s21, 2048  ;;  %p3256_p6 = scmp.lt.s32.totalorder %s3686_s21, %s3686_s21 }
  0x45   : > { %p3249_p0 = scmp.ne.s32.totalorder %s3686_s21, %s3248_s16  ;;  %p3257_p8 = scmp.lt.s32.totalorder %s3248_s16, %s3248_s16 }
  0x47   : > { %p3251_p2 = pnand %p3249_p0, %p3696_p7  ;;  %p3258_p9 = por %p3257_p8, %p3256_p6 }
  0x49   : > { %p3252_p4 = pneg %p3251_p2 }
  0x4b   : > { %p3259_p10 = pnand %p3258_p9, %p3252_p4 }
  0x4d   : > { %3262 = shalt.err (!%p3259_p10)
}
  0x4e   : > { %s4395_s23 = smov 64   ;;  %s4396_s9 = smov 4  }
  0x4f   : > { %2878 = dma.hbm_to_vmem [thread:$0]  (!%p3682_p5), %s4430_s7, 2048, %s3686_s21, [#allocation17], %s4395_s23, %s4395_s23, %s4396_s9  }
  0x50   : > { %s38_s25 = sadd.s32 1, %s3559_s13  ;;  %s116_s26 = sadd.s32 1, %s3551_s11 }
  0x51   : > { %p39_p11 = scmp.ge.s32.totalorder %s38_s25, 5  ;;  %p123_p12 = scmp.ne.s32.totalorder %s3551_s11, %s3547_s10 }
  0x52   : > { %p124_p13 = scmp.eq.s32.totalorder %s3563_s14, 0  ;;  %p129_p0 = scmp.ne.s32.totalorder %s3547_s10, %s3543_s30 }
  0x53   : > { %s4476_s25 = smov (%p39_p11, %s38_s25), 0  ;;  %p2900_p6 = scmp.lt.s32.totalorder %s3563_s14, 5 }
  0x54   : > { %4431 = sst [smem:[#allocation29_spill]] %s4476_s25  ;;  %p125_p2 = por %p124_p13, %p123_p12 }
  0x55   : > { %p3757_p4 = por %p4402_p1, %p129_p0  ;;  %s113_s29 = ssub.s32 %s3559_s13, %s4476_s25 }
  0x56   : > { %p114_p8 = scmp.eq.s32.totalorder %s113_s29, 0  ;;  %s4404_s21 = sand.u32 1, %s3563_s14  }
  0x57   : > { %s4432_s28 = scalar_select %p3757_p4, 1, 0 }
  0x58   : > { %s3766_s15 = sand.u32 1, %s3551_s11   ;;  %p3772_p9 = pnand %p2900_p6, %p125_p2 }
  0x59   : > { %4433 = sst [smem:[#allocation30_spill]] %s4432_s28  ;;  %s2831_s30 = smul.u32 768, %s3766_s15 }
  0x5a   : > { %s3769_s16 = scalar_select %p114_p8, %s3551_s11, %s116_s26  }
  0x5b   : > { %s4435_s12 = scalar_select %p3772_p9, 1, 0 }
  0x5c   : > { %4434 = sst [smem:[#allocation31_spill]] %s3769_s16  ;;  %s2832_s24 = smul.u32 12288, %s3559_s13 }
  0x5d   : > { %s4436_s3 = sld [smem:[#allocation33_spill]]  ;;  %s367_s29 = scalar_lea.vmem [#allocation10], %s2831_s30 }
  0x5e   : > { %s374_s22 = sshll.u32 %s367_s29, 4  ;;  %s2555_s26 = sshll.u32 %s3766_s15, 8  ;;  %s3782_s22 = int_to_ptr.vmem [resolvable:$true] %s374_s22 }
  0x5f   : > { %s3787_s1 = scalar_lea.sflag [#allocation11], %s4404_s21  ;;  %p3793_p11 = pneg %p3772_p9 }
  0x61   : > { %s4437_s25 = scalar_select %p3793_p11, 1, 0 }
  0x63   : > { %s3780_s20 = scalar_lea.hbm %s4436_s3, %s2832_s24  ;;  %s3268_s30 = scalar_lea.hbm %s4436_s3, 61440 }
  0x64   : > { %s3263_s7 = scalar_lea.hbm %s3780_s20, 12288  ;;  %p3269_p0 = scmp.lt.u32.totalorder %s3780_s20, %s4436_s3 }
  0x65   : > { %p3264_p10 = scmp.ne.s32.totalorder %s3780_s20, %s3263_s7  ;;  %p3270_p2 = scmp.lt.u32.totalorder %s3268_s30, %s3263_s7 }
  0x66   : > { %p3272_p8 = scmp.lt.u32.totalorder %s3263_s7, %s3780_s20 }
  0x67   : > { %p3266_p12 = pnand %p3793_p11, %p3264_p10  ;;  %p3271_p6 = por %p3270_p2, %p3269_p0 }
  0x69   : > { %p3267_p13 = pneg %p3266_p12  ;;  %p3273_p1 = por %p3272_p8, %p3271_p6 }
  0x6b   : > { %p3274_p4 = pnand %p3273_p1, %p3267_p13 }
  0x6d   : > { %3277 = shalt.err (!%p3274_p4)
}
  0x6e   : > { %s3278_s21 = scalar_lea.vmem %s3782_s22, 12288  ;;  %s3571_s23 = smov [#allocation10]  }
  0x6f   : > { %p3279_p10 = scmp.ne.s32.totalorder %s3782_s22, %s3278_s21  ;;  %s3283_s9 = sshll.u32 %s3571_s23, 4  ;;  %s3284_s9 = int_to_ptr.vmem [resolvable:$false] %s3283_s9 }
  0x70   : > { %s3285_s24 = scalar_lea.vmem %s3284_s9, 24576  ;;  %p3286_p5 = scmp.lt.s32.totalorder %s3782_s22, %s3284_s9 }
  0x71   : > { %p3281_p12 = pnand %p3279_p10, %p3793_p11  ;;  %p3287_p7 = scmp.lt.s32.totalorder %s3285_s24, %s3278_s21 }
  0x73   : > { %p3282_p3 = pneg %p3281_p12  ;;  %p3288_p0 = por %p3287_p7, %p3286_p5 }
  0x75   : > { %p3289_p2 = pnand %p3288_p0, %p3282_p3 }
  0x77   : > { %3292 = shalt.err (!%p3289_p2)
}
  0x78   : > { %s4438_s7 = smov 8   ;;  %s4439_s30 = smov 128  }
  0x79   : > { %2885 = dma.hbm_to_vmem [thread:$0]  (!%p3772_p9), %s3780_s20, 12288, %s3782_s22, %s3787_s1, %s4439_s30, %s4439_s30, %s4438_s7  }
  0x7a   : > { %s2745_s29 = sshll.u32 %s3559_s13, 12  ;;  %s4440_s5 = sld [smem:[#allocation34_spill]] }
  0x7b   : > { %s407_s24 = scalar_lea.vmem [#allocation13], %s2555_s26  ;;  %s4441_s16 = sand.u32 1, %s3563_s14  }
  0x7c   : > { %s414_s3 = sshll.u32 %s407_s24, 4  ;;  %s3832_s11 = scalar_lea.sflag [#allocation14], %s4441_s16  ;;  %s3828_s3 = int_to_ptr.vmem [resolvable:$true] %s414_s3 }
  0x80   : > { %s3824_s21 = scalar_lea.hbm %s4440_s5, %s2745_s29  ;;  %s3298_s29 = scalar_lea.hbm %s4440_s5, 20480 }
  0x81   : > { %s3293_s28 = scalar_lea.hbm %s3824_s21, 4096  ;;  %p3299_p7 = scmp.lt.u32.totalorder %s3824_s21, %s4440_s5 }
  0x82   : > { %p3294_p1 = scmp.ne.s32.totalorder %s3824_s21, %s3293_s28  ;;  %p3300_p4 = scmp.lt.u32.totalorder %s3298_s29, %s3293_s28 }
  0x83   : > { %p3302_p6 = scmp.lt.u32.totalorder %s3293_s28, %s3824_s21 }
  0x84   : > { %p3296_p3 = pnand %p3294_p1, %p3793_p11  ;;  %p3301_p13 = por %p3300_p4, %p3299_p7 }
  0x86   : > { %p3297_p5 = pneg %p3296_p3  ;;  %p3303_p8 = por %p3302_p6, %p3301_p13 }
  0x88   : > { %p3304_p10 = pnand %p3303_p8, %p3297_p5 }
  0x8a   : > { %3307 = shalt.err (!%p3304_p10)
}
  0x8b   : > { %s3308_s16 = scalar_lea.vmem %s3828_s3, 4096  ;;  %s3572_s26 = smov [#allocation13]  }
  0x8c   : > { %p3309_p12 = scmp.ne.s32.totalorder %s3828_s3, %s3308_s16  ;;  %s3313_s24 = sshll.u32 %s3572_s26, 4  ;;  %s3314_s24 = int_to_ptr.vmem [resolvable:$false] %s3313_s24 }
  0x8d   : > { %s3315_s20 = scalar_lea.vmem %s3314_s24, 8192  ;;  %p3316_p1 = scmp.lt.s32.totalorder %s3828_s3, %s3314_s24 }
  0x8e   : > { %p3311_p0 = pnand %p3309_p12, %p3793_p11  ;;  %p3317_p3 = scmp.lt.s32.totalorder %s3315_s20, %s3308_s16 }
  0x90   : > { %p3312_p2 = pneg %p3311_p0  ;;  %p3318_p7 = por %p3317_p3, %p3316_p1 }
  0x92   : > { %p3319_p4 = pnand %p3318_p7, %p3312_p2 }
  0x94   : > { %3322 = shalt.err (!%p3319_p4)
}
  0x95   : > { %2891 = dma.hbm_to_vmem [thread:$0]  (!%p3772_p9), %s3824_s21, 4096, %s3828_s3, %s3832_s11, %s4439_s30, %s4439_s30, %s4438_s7  }
  0x96   : > { %s3573_s28 = smov [#allocation4]   ;;  %s3574_s29 = smov [#allocation9]  }
  0x97   : > { %s301_s22 = sshll.u32 %s3573_s28, 4  ;;  %s328_s23 = sshll.u32 %s3574_s29, 4  ;;  %s302_s22 = int_to_ptr.vmem [resolvable:$true] %s301_s22  ;;  %s329_s23 = int_to_ptr.vmem [resolvable:$true] %s328_s23 }
  0x98   : > { %s3323_s26 = scalar_lea.hbm %s4382_s0, 256  ;;  %p4442_p13 = scmp.ne.s32.totalorder %s4429_s27, 0 }
  0x99   : > { %p3324_p5 = scmp.ne.s32.totalorder %s4382_s0, %s3323_s26  ;;  %p3330_p10 = scmp.lt.u32.totalorder %s3323_s26, %s4382_s0 }
  0x9b   : > { %p3326_p6 = pnand %p3324_p5, %p4442_p13 }
  0x9d   : > { %p3327_p8 = pneg %p3326_p6 }
  0x9f   : > { %p3332_p12 = pnand %p3330_p10, %p3327_p8 }
  0xa1   : > { %3335 = shalt.err (!%p3332_p12)
}
  0xa2   : > { %s3336_s3 = scalar_lea.vmem %s302_s22, 256  ;;  %p3344_p3 = scmp.lt.s32.totalorder %s302_s22, %s302_s22 }
  0xa3   : > { %p3337_p0 = scmp.ne.s32.totalorder %s302_s22, %s3336_s3  ;;  %p3345_p7 = scmp.lt.s32.totalorder %s3336_s3, %s3336_s3 }
  0xa5   : > { %p3339_p2 = pnand %p3337_p0, %p4442_p13  ;;  %p3346_p4 = por %p3345_p7, %p3344_p3 }
  0xa7   : > { %p3340_p1 = pneg %p3339_p2 }
  0xa9   : > { %p3347_p9 = pnand %p3346_p4, %p3340_p1 }
  0xab   : > { %3350 = shalt.err (!%p3347_p9)
}
  0xac   : > { %p4443_p5 = scmp.ne.s32.totalorder %s4427_s19, 0  ;;  %s4444_s7 = smov 4  }
  0xad   : > { %s4445_s30 = smov 64   ;;  %s3351_s29 = scalar_lea.hbm %s4384_s2, 32 }
  0xae   : > { %2869 = dma.hbm_to_vmem [thread:$0]  (!%p4443_p5), %s4382_s0, 256, %s302_s22, [#allocation5], %s4445_s30, %s4445_s30, %s4444_s7  }
  0xaf   : > { %p3352_p6 = scmp.ne.s32.totalorder %s4384_s2, %s3351_s29  ;;  %p3358_p10 = scmp.lt.u32.totalorder %s3351_s29, %s4384_s2 }
  0xb1   : > { %p3354_p9 = pnand %p3352_p6, %p4442_p13 }
  0xb3   : > { %p3355_p8 = pneg %p3354_p9 }
  0xb5   : > { %p3360_p12 = pnand %p3358_p10, %p3355_p8 }
  0xb7   : > { %3363 = shalt.err (!%p3360_p12)
}
  0xb8   : > { %s3364_s20 = scalar_lea.vmem %s329_s23, 32  ;;  %p3372_p3 = scmp.lt.s32.totalorder %s329_s23, %s329_s23 }
  0xb9   : > { %p3365_p0 = scmp.ne.s32.totalorder %s329_s23, %s3364_s20  ;;  %p3373_p7 = scmp.lt.s32.totalorder %s3364_s20, %s3364_s20 }
  0xbb   : > { %p3367_p2 = pnand %p3365_p0, %p4442_p13  ;;  %p3374_p4 = por %p3373_p7, %p3372_p3 }
  0xbd   : > { %p3368_p1 = pneg %p3367_p2 }
  0xbf   : > { %p3375_p11 = pnand %p3374_p4, %p3368_p1 }
  0xc1   : > { %3378 = shalt.err (!%p3375_p11)
}
  0xc2   : > { %2875 = dma.hbm_to_vmem [thread:$0]  (!%p4443_p5), %s4384_s2, 32, %s329_s23, [#allocation8]  }
  0xc3   : > { %s3575_s7 = smov [#allocation18]   ;;  %s2552_s5 = sshll.u32 %s3766_s15, 1 }
  0xc4   : > { %s352_s30 = sshll.u32 %s3575_s7, 4  ;;  %s3379_s28 = scalar_lea.hbm %s4390_s8, 16  ;;  %s353_s30 = int_to_ptr.vmem [resolvable:$true] %s352_s30 }
  0xc5   : > { %p3380_p11 = scmp.ne.s32.totalorder %s4390_s8, %s3379_s28  ;;  %p3386_p8 = scmp.lt.u32.totalorder %s3379_s28, %s4390_s8 }
  0xc7   : > { %p3382_p6 = pnand %p3380_p11, %p4442_p13 }
  0xc9   : > { %p3383_p9 = pneg %p3382_p6 }
  0xcb   : > { %p3388_p10 = pnand %p3386_p8, %p3383_p9 }
  0xcd   : > { %3391 = shalt.err (!%p3388_p10)
}
  0xce   : > { %s3392_s23 = scalar_lea.vmem %s353_s30, 16  ;;  %s3399_s24 = scalar_lea.vmem %s353_s30, 32 }
  0xcf   : > { %p3393_p12 = scmp.ne.s32.totalorder %s353_s30, %s3392_s23  ;;  %p3400_p1 = scmp.lt.s32.totalorder %s353_s30, %s353_s30 }
  0xd0   : > { %p3401_p3 = scmp.lt.s32.totalorder %s3399_s24, %s3392_s23 }
  0xd1   : > { %p3395_p0 = pnand %p3393_p12, %p4442_p13 }
  0xd2   : > { %p3402_p7 = por %p3401_p3, %p3400_p1 }
  0xd3   : > { %p3396_p2 = pneg %p3395_p0 }
  0xd5   : > { %p3403_p4 = pnand %p3402_p7, %p3396_p2 }
  0xd7   : > { %3406 = shalt.err (!%p3403_p4)
}
  0xd8   : > { %2881 = dma.hbm_to_vmem [thread:$0]  (!%p4443_p5), %s4390_s8, 16, %s353_s30, [#allocation17]  }
  0xd9   : > { %s2744_s3 = sshll.u32 %s3559_s13, 5  ;;  %s388_s27 = scalar_lea.vmem [#allocation12], %s2552_s5 }
  0xda   : > { %s396_s7 = sshll.u32 %s388_s27, 4  ;;  %s394_s28 = scalar_lea.hbm %s4386_s4, %s2744_s3  ;;  %s397_s7 = int_to_ptr.vmem [resolvable:$true] %s396_s7 }
  0xdb   : > { %s3407_s29 = scalar_lea.hbm %s394_s28, 32  ;;  %p4446_p11 = scmp.ne.s32.totalorder %s4437_s25, 0 }
  0xdc   : > { %p3408_p13 = scmp.ne.s32.totalorder %s394_s28, %s3407_s29  ;;  %s3412_s16 = scalar_lea.hbm %s4386_s4, 160 }
  0xdd   : > { %p3413_p5 = scmp.lt.u32.totalorder %s394_s28, %s4386_s4  ;;  %p3414_p8 = scmp.lt.u32.totalorder %s3412_s16, %s3407_s29 }
  0xde   : > { %p3410_p6 = pnand %p3408_p13, %p4446_p11  ;;  %p3416_p12 = scmp.lt.u32.totalorder %s3407_s29, %s394_s28 }
  0xdf   : > { %p3415_p10 = por %p3414_p8, %p3413_p5 }
  0xe0   : > { %p3411_p9 = pneg %p3410_p6 }
  0xe1   : > { %p3417_p0 = por %p3416_p12, %p3415_p10 }
  0xe3   : > { %p3418_p2 = pnand %p3417_p0, %p3411_p9 }
  0xe5   : > { %3421 = shalt.err (!%p3418_p2)
}
  0xe6   : > { %s3422_s23 = scalar_lea.vmem %s397_s7, 32  ;;  %s3576_s24 = smov [#allocation12]  }
  0xe7   : > { %p3423_p1 = scmp.ne.s32.totalorder %s397_s7, %s3422_s23  ;;  %s3427_s20 = sshll.u32 %s3576_s24, 4  ;;  %s3428_s20 = int_to_ptr.vmem [resolvable:$false] %s3427_s20 }
  0xe8   : > { %s3429_s22 = scalar_lea.vmem %s3428_s20, 64  ;;  %p3430_p4 = scmp.lt.s32.totalorder %s397_s7, %s3428_s20 }
  0xe9   : > { %p3425_p3 = pnand %p3423_p1, %p4446_p11  ;;  %p3431_p13 = scmp.lt.s32.totalorder %s3429_s22, %s3422_s23 }
  0xeb   : > { %p3426_p7 = pneg %p3425_p3  ;;  %p3432_p6 = por %p3431_p13, %p3430_p4 }
  0xed   : > { %p3433_p5 = pnand %p3432_p6, %p3426_p7 }
  0xef   : > { %3436 = shalt.err (!%p3433_p5)
}
  0xf0   : > { %p4447_p8 = scmp.ne.s32.totalorder %s4435_s12, 0  ;;  %s3943_s21 = scalar_lea.hbm %s4388_s6, %s2744_s3 }
  0xf1   : > { %s428_s29 = scalar_lea.vmem [#allocation15], %s2552_s5  ;;  %s3437_s9 = scalar_lea.hbm %s3943_s21, 32 }
  0xf2   : > { %2888 = dma.hbm_to_vmem [thread:$0]  (!%p4447_p8), %s394_s28, 32, %s397_s7, %s3787_s1  }
  0xf3   : > { %s436_s19 = sshll.u32 %s428_s29, 4  ;;  %p3438_p9 = scmp.ne.s32.totalorder %s3943_s21, %s3437_s9  ;;  %s437_s19 = int_to_ptr.vmem [resolvable:$true] %s436_s19 }
  0xf4   : > { %s3442_s28 = scalar_lea.hbm %s4388_s6, 160  ;;  %p3443_p0 = scmp.lt.u32.totalorder %s3943_s21, %s4388_s6 }
  0xf5   : > { %p3440_p10 = pnand %p3438_p9, %p4446_p11  ;;  %p3444_p2 = scmp.lt.u32.totalorder %s3442_s28, %s3437_s9 }
  0xf6   : > { %p3446_p3 = scmp.lt.u32.totalorder %s3437_s9, %s3943_s21 }
  0xf7   : > { %p3441_p12 = pneg %p3440_p10  ;;  %p3445_p1 = por %p3444_p2, %p3443_p0 }
  0xf9   : > { %p3447_p7 = por %p3446_p3, %p3445_p1 }
  0xfb   : > { %p3448_p4 = pnand %p3447_p7, %p3441_p12 }
  0xfd   : > { %3451 = shalt.err (!%p3448_p4)
}
  0xfe   : > { %s3452_s15 = scalar_lea.vmem %s437_s19, 32  ;;  %s3577_s5 = smov [#allocation15]  }
  0xff   : > { %p3453_p13 = scmp.ne.s32.totalorder %s437_s19, %s3452_s15  ;;  %s3457_s30 = sshll.u32 %s3577_s5, 4  ;;  %s3458_s30 = int_to_ptr.vmem [resolvable:$false] %s3457_s30 }
 0x100   : > { %s3459_s26 = scalar_lea.vmem %s3458_s30, 64  ;;  %p3460_p9 = scmp.lt.s32.totalorder %s437_s19, %s3458_s30 }
 0x101   : > { %p3455_p6 = pnand %p3453_p13, %p4446_p11  ;;  %p3461_p10 = scmp.lt.s32.totalorder %s3459_s26, %s3452_s15 }
 0x103   : > { %p3456_p5 = pneg %p3455_p6  ;;  %p3462_p8 = por %p3461_p10, %p3460_p9 }
 0x105   : > { %p3463_p0 = pnand %p3462_p8, %p3456_p5 }
 0x107   : > { %3466 = shalt.err (!%p3463_p0)
}
 0x108   : > { %p4448_p2 = scmp.ne.s32.totalorder %s4435_s12, 0  ;;  %p4449_p12 = scmp.ne.s32.totalorder %s4426_s18, 0 }
 0x109   : > { %p4450_p11 = scmp.eq.s32.totalorder (!%p4449_p12), %s3667_s17, 0 }
 0x10a   : > { %2894 = dma.hbm_to_vmem [thread:$0]  (!%p4448_p2), %s3943_s21, 32, %s437_s19, %s3832_s11  }
 0x10b   : > { %445 = sbr.rel (%p4449_p12) target bundleno = 1506 (0x5e2), region = 56 }
 0x112   : > { %3518 = dma.done.wait (%p4450_p11), [#allocation5], 256   ;;  %p4451_p1 = pmov %p4450_p11 }
 0x114   : > { %3520 = vsyncadd (%p4451_p1), [#allocation5], 4294967040  ;;  %p4452_p3 = pmov %p4451_p1 }
 0x115   : > { %p4453_p8 = pmov %p4451_p1 }
 0x116   : > { %3522 = dma.done.wait (%p4452_p3), [#allocation8], 2080  }
 0x117   : > { %3524 = vsyncadd (%p4453_p8), [#allocation8], 4294965216  ;;  %s4454_s25 = sld [smem:[#allocation30_spill]]  ;;  %s459_s12 = sand.u32 1, %s3667_s17  }
 0x118   : > { %s461_s11 = sand.u32 1, %s3547_s10   ;;  %s460_s18 = scalar_lea.sflag [#allocation11], %s459_s12 }
 0x119   : > { %s2833_s23 = smul.u32 768, %s461_s11 }
 0x11b   : > { %s3977_s24 = scalar_lea.vmem [#allocation10], %s2833_s23 }
 0x11d   : > { %p4455_p7 = scmp.ne.s32.totalorder %s4454_s25, 0 }
 0x11f   : > { %3526 = dma.done.wait (%p4455_p7), %s460_s18, 12320  }
 0x120   : > { %3528 = vsyncadd (%p4455_p7), %s460_s18, 4294954976  ;;  %s2565_s20 = sshll.u32 %s461_s11, 1  ;;  %s2566_s22 = sshll.u32 %s461_s11, 8 }
 0x121   : > { %s3983_s27 = scalar_lea.vmem [#allocation12], %s2565_s20  ;;  %s478_s14 = scalar_lea.sflag [#allocation14], %s459_s12 }
 0x122   : > { %s3985_s21 = scalar_lea.vmem [#allocation13], %s2566_s22 }
 0x123   : > { %3530 = dma.done.wait (%p4455_p7), %s478_s14, 4128  }
 0x124   : > { %3532 = vsyncadd (%p4455_p7), %s478_s14, 4294963168  ;;  %s3991_s29 = scalar_lea.vmem [#allocation15], %s2565_s20  ;;  %p4456_p4 = pmov %p4451_p1 }
 0x125   : > { %p4457_p13 = pmov %p4451_p1 }
 0x126   : > { %3534 = dma.done.wait (%p4456_p4), [#allocation17], 2064  }
 0x127   : > { %3536 = vsyncadd (%p4457_p13), [#allocation17], 4294965232  ;;  %s4458_s19 = sld [smem:[#allocation27_spill]] }
 0x12d   : > { %p2570_p6 = scmp.ne.s32.totalorder %s4458_s19, 0 }
 0x12e   : > { %v2973_v0 = vld [vmem:[#allocation7 + $0x4] ss:$8 sps:$4 sm:$0xff] (!%p2570_p6)   ;;  %v2975_v1 = vld [vmem:[#allocation7] ss:$8 sps:$4 sm:$0xff] (!%p2570_p6)   ;;  %v3578_v2 = vmov (!%p2570_p6), 0   ;;  %v2997_v17 = vld [vmem:[#allocation4] sm:$0xff] (!%p2570_p6)   ;;  %v572_v19 = vlaneseq (!%p2570_p6) }
 0x12f   : > { %549 = sbr.rel (%p2570_p6) target bundleno = 554 (0x22a), region = 96  ;;  %706 = vmatprep.mubr.bf16.mxu0 (!%p2570_p6), %v3578_v2  ;;  %716 = vmatprep.mubr.bf16.mxu1 (!%p2570_p6), %v3578_v2  ;;  %v2976_v3 = vld [vmem:[#allocation7 + $0x14] ss:$8 sps:$4 sm:$0xff] (!%p2570_p6)   ;;  %v2978_v4 = vld [vmem:[#allocation7 + $0x10] ss:$8 sps:$4 sm:$0xff] (!%p2570_p6)  }
 0x130   : > { %674 = vmatprep.subr.bf16.mxu0 (!%p2570_p6), %v2973_v0  ;;  %2775 = vmatprep.subr.bf16.mxu1 (!%p2570_p6), %v2973_v0  ;;  %v2979_v5 = vld [vmem:[#allocation7 + $0x24] ss:$8 sps:$4 sm:$0xff] (!%p2570_p6)   ;;  %v2981_v6 = vld [vmem:[#allocation7 + $0x20] ss:$8 sps:$4 sm:$0xff] (!%p2570_p6)   ;;  %v2982_v7 = vld [vmem:[#allocation7 + $0x34] ss:$8 sps:$4 sm:$0xff] (!%p2570_p6)  }
 0x131   : > { %675 = vmatpush1.bf16.msra.mxu0 (!%p2570_p6), %v2975_v1  ;;  %2783 = vmatpush1.bf16.msra.mxu1 (!%p2570_p6), %v2975_v1  ;;  %v2984_v8 = vld [vmem:[#allocation7 + $0x30] ss:$8 sps:$4 sm:$0xff] (!%p2570_p6)   ;;  %v2985_v9 = vld [vmem:[#allocation7 + $0x44] ss:$8 sps:$4 sm:$0xff] (!%p2570_p6)   ;;  %v2987_v10 = vld [vmem:[#allocation7 + $0x40] ss:$8 sps:$4 sm:$0xff] (!%p2570_p6)  }
 0x132   : > { %676 = vmatprep.subr.bf16.mxu0 (!%p2570_p6), %v2976_v3  ;;  %2776 = vmatprep.subr.bf16.mxu1 (!%p2570_p6), %v2976_v3  ;;  %v2988_v11 = vld [vmem:[#allocation7 + $0x54] ss:$8 sps:$4 sm:$0xff] (!%p2570_p6)   ;;  %v2990_v12 = vld [vmem:[#allocation7 + $0x50] ss:$8 sps:$4 sm:$0xff] (!%p2570_p6)   ;;  %v2991_v13 = vld [vmem:[#allocation7 + $0x64] ss:$8 sps:$4 sm:$0xff] (!%p2570_p6)  }
 0x133   : > { %v2993_v14 = vld [vmem:[#allocation7 + $0x60] ss:$8 sps:$4 sm:$0xff] (!%p2570_p6)   ;;  %v2994_v15 = vld [vmem:[#allocation7 + $0x74] ss:$8 sps:$4 sm:$0xff] (!%p2570_p6)   ;;  %v2996_v16 = vld [vmem:[#allocation7 + $0x70] ss:$8 sps:$4 sm:$0xff] (!%p2570_p6)  }
 0x134   : > { %v2998_v18 = vld [vmem:[#allocation4 + $0x8] sm:$0xff] (!%p2570_p6)   ;;  %v573_v20 = vshrl.u32 (!%p2570_p6), %v572_v19, 7  ;;  %v570_v22 = vld [vmem:[#allocation9] sm:$0x3] (!%p2570_p6) }
 0x135   : > { %677 = vmatpush1.bf16.msra.mxu0 (!%p2570_p6), %v2978_v4  ;;  %2784 = vmatpush1.bf16.msra.mxu1 (!%p2570_p6), %v2978_v4 }
 0x136   : > { %678 = vmatprep.subr.bf16.mxu0 %v2979_v5  ;;  %2777 = vmatprep.subr.bf16.mxu1 %v2979_v5  ;;  %v574_v21 = vsub.s32 0, %v573_v20  ;;  %v578_v23 = vsub.s32 1, %v573_v20 }
 0x138   : > { %v575_v24 = vrot.slane %v570_v22, %v574_v21  ;;  %v579_v25 = vrot.slane %v570_v22, %v578_v23 }
 0x139   : > { %679 = vmatpush1.bf16.msra.mxu0 %v2981_v6  ;;  %2785 = vmatpush1.bf16.msra.mxu1 %v2981_v6 }
 0x13a   : > { %680 = vmatprep.subr.bf16.mxu0 %v2982_v7  ;;  %2778 = vmatprep.subr.bf16.mxu1 %v2982_v7 }
 0x13d   : > { %681 = vmatpush1.bf16.msra.mxu0 %v2984_v8  ;;  %2786 = vmatpush1.bf16.msra.mxu1 %v2984_v8 }
 0x13e   : > { %682 = vmatprep.subr.bf16.mxu0 %v2985_v9  ;;  %2779 = vmatprep.subr.bf16.mxu1 %v2985_v9 }
 0x141   : > { %683 = vmatpush1.bf16.msra.mxu0 %v2987_v10  ;;  %2787 = vmatpush1.bf16.msra.mxu1 %v2987_v10 }
 0x142   : > { %684 = vmatprep.subr.bf16.mxu0 %v2988_v11  ;;  %2780 = vmatprep.subr.bf16.mxu1 %v2988_v11 }
 0x145   : > { %685 = vmatpush1.bf16.msra.mxu0 %v2990_v12  ;;  %2788 = vmatpush1.bf16.msra.mxu1 %v2990_v12 }
 0x146   : > { %686 = vmatprep.subr.bf16.mxu0 %v2991_v13  ;;  %2781 = vmatprep.subr.bf16.mxu1 %v2991_v13 }
 0x149   : > { %687 = vmatpush1.bf16.msra.mxu0 %v2993_v14  ;;  %2789 = vmatpush1.bf16.msra.mxu1 %v2993_v14 }
 0x14a   : > { %688 = vmatprep.subr.bf16.mxu0 %v2994_v15  ;;  %2782 = vmatprep.subr.bf16.mxu1 %v2994_v15 }
 0x14d   : > { %689 = vmatpush1.bf16.msra.mxu0 %v2996_v16  ;;  %2790 = vmatpush1.bf16.msra.mxu1 %v2996_v16 }
 0x150   : > { %707 = vmatmul.mubr.bf16.vlgmr.msra.gmra.mrb[0].mxu0 %v2997_v17  ;;  %717 = vmatmul.mubr.bf16.vlgmr.msra.gmra.mrb[0].mxu1 %v2998_v18 }
 0x223   : > { %v708_v26 = vpop.f32.mrb[0].mxu0  ;;  %v718_v27 = vpop.f32.mrb[0].mxu1 }
 0x224   : > { %v709_v28 = vadd.f32 %v708_v26, %v575_v24  ;;  %v719_v29 = vadd.f32 %v718_v27, %v575_v24  ;;  %v710_v30 = vpop.f32.mrb[1].mxu0  ;;  %v720_v31 = vpop.f32.mrb[1].mxu1 }
 0x225   : > { %v711_v32 = vadd.f32 %v710_v30, %v579_v25  ;;  %v721_v33 = vadd.f32 %v720_v31, %v579_v25  ;;  %v712_v34 = vpop.f32.mrb[2].mxu0  ;;  %v722_v35 = vpop.f32.mrb[2].mxu1 }
 0x226   : > { %727 = vst [vmem:[#allocation2] sm:$0xff] %v709_v28  ;;  %731 = vst [vmem:[#allocation2 + $0x20] sm:$0xff] %v719_v29  ;;  %v713_v36 = vadd.f32 %v712_v34, %v575_v24  ;;  %v723_v37 = vadd.f32 %v722_v35, %v575_v24  ;;  %v714_v38 = vpop.f32.mrb[3].mxu0  ;;  %v724_v39 = vpop.f32.mrb[3].mxu1 }
 0x227   : > { %728 = vst [vmem:[#allocation2 + $0x8] sm:$0xff] %v711_v32  ;;  %732 = vst [vmem:[#allocation2 + $0x28] sm:$0xff] %v721_v33  ;;  %v715_v40 = vadd.f32 %v714_v38, %v579_v25  ;;  %v725_v41 = vadd.f32 %v724_v39, %v579_v25 }
 0x228   : > { %729 = vst [vmem:[#allocation2 + $0x10] sm:$0xff] %v713_v36  ;;  %733 = vst [vmem:[#allocation2 + $0x30] sm:$0xff] %v723_v37 }
 0x229   : > { %730 = vst [vmem:[#allocation2 + $0x18] sm:$0xff] %v715_v40  ;;  %734 = vst [vmem:[#allocation2 + $0x38] sm:$0xff] %v725_v41 }
 0x22a PF: > { %v743_v44 = vlaneseq }
 0x22c   : > { %v4014_v50 = vshrl.u32 %v743_v44, 7 }
 0x22d   : > { %v4000_v42 = vld [vmem:[#allocation2] sm:$0xff] }
 0x22e   : > { %v4004_v45 = vld [vmem:[#allocation2 + $0x8] sm:$0xff]  ;;  %v4010_v48 = vld [vmem:[#allocation2 + $0x20] sm:$0xff]  ;;  %v746_v56 = vadd.s32 16, %v4014_v50  ;;  %v4028_v57 = vand.u32 15, %v4014_v50  ;;  %806 = sbr.rel (%p2570_p6) target bundleno = 577 (0x241), region = 100  ;;  %v807_v59 = vrot.slane (!%p2570_p6), %v4000_v42, 6 }
 0x22f   : > { %v4002_v43 = vld [vmem:[#allocation2 + $0x10] sm:$0xff]  ;;  %v4020_v53 = vld [vmem:[#allocation2 + $0x28] sm:$0xff]  ;;  %vm815_vm0 = vcmp.lt.s32.totalorder (!%p2570_p6), %v4014_v50, 2  ;;  %v808_v62 = vrot.slane (!%p2570_p6), %v4004_v45, 6  ;;  %v811_v3 = vrot.slane (!%p2570_p6), %v4010_v48, 6  ;;  %v852_v18 = vrot.slane (!%p2570_p6), %v4000_v42, 7 }
 0x230   : > { %v796_v46 = vpack.c.bf16 %v4002_v43, %v4000_v42  ;;  %v4008_v47 = vld [vmem:[#allocation2 + $0x18] sm:$0xff]  ;;  %v4012_v49 = vld [vmem:[#allocation2 + $0x30] sm:$0xff]  ;;  %v4030_v58 = vand.u32 15, %v746_v56  ;;  %v809_v60 = vrot.slane (!%p2570_p6), %v4002_v43, 6  ;;  %vm824_vm1 = vcmp.ge.s32.totalorder (!%p2570_p6), %v4028_v57, 2 }
 0x231   : > { %v797_v51 = vpack.c.bf16 %v4008_v47, %v4004_v45  ;;  %v798_v52 = vpack.c.bf16 %v4012_v49, %v4010_v48  ;;  %v4022_v54 = vld [vmem:[#allocation2 + $0x38] sm:$0xff]  ;;  %v813_v61 = vrot.slane (!%p2570_p6), %v4012_v49, 6  ;;  %v810_v63 = vrot.slane (!%p2570_p6), %v4008_v47, 6 }
 0x232   : > { %800 = vst [vmem:[#allocation3 + $0x20] sm:$0xff] %v796_v46  ;;  %v799_v55 = vpack.c.bf16 %v4022_v54, %v4020_v53  ;;  %v814_v0 = vrot.slane (!%p2570_p6), %v4022_v54, 6  ;;  %v820_v1 = vsel (!%p2570_p6), %vm815_vm0, %v807_v59, %v809_v60  ;;  %vm826_vm2 = vcmp.ge.s32.totalorder (!%p2570_p6), %v4030_v58, 2 }
 0x233   : > { %801 = vst [vmem:[#allocation3 + $0x28] sm:$0xff] %v797_v51  ;;  %802 = vst [vmem:[#allocation3 + $0x50] sm:$0xff] %v798_v52  ;;  %v822_v2 = vsel (!%p2570_p6), %vm815_vm0, %v813_v61, %v807_v59  ;;  %v821_v5 = vsel (!%p2570_p6), %vm815_vm0, %v808_v62, %v810_v63  ;;  %v812_v7 = vrot.slane (!%p2570_p6), %v4020_v53, 6  ;;  %v816_v10 = vsel (!%p2570_p6), %vm815_vm0, %v811_v3, %v813_v61 }
 0x234   : > { %803 = vst [vmem:[#allocation3 + $0x58] sm:$0xff] %v799_v55  ;;  %v836_v4 = vsel (!%p2570_p6), %vm824_vm1, %v822_v2, 0.0  ;;  %v823_v6 = vsel (!%p2570_p6), %vm815_vm0, %v814_v0, %v808_v62  ;;  %v818_v11 = vsel (!%p2570_p6), %vm815_vm0, %v809_v60, %v811_v3  ;;  %v854_v19 = vrot.slane (!%p2570_p6), %v4002_v43, 7 }
 0x235   : > { %v844_v8 = vpack.c.bf16 %v820_v1, %v836_v4  ;;  %v837_v9 = vsel %vm824_vm1, %v823_v6, 0.0  ;;  %v840_v13 = vsel %vm826_vm2, %v818_v11, 0.0  ;;  %v817_v14 = vsel %vm815_vm0, %v812_v7, %v814_v0 }
 0x236   : > { %v845_v12 = vpack.c.bf16 %v821_v5, %v837_v9  ;;  %v819_v15 = vsel %vm815_vm0, %v810_v63, %v812_v7  ;;  %v846_v16 = vpack.c.bf16 %v816_v10, %v840_v13  ;;  %v858_v21 = vrot.slane %v4012_v49, 7 }
 0x237   : > { %848 = vst [vmem:[#allocation3] sm:$0xff] %v844_v8  ;;  %v841_v17 = vsel %vm826_vm2, %v819_v15, 0.0  ;;  %vm860_vm3 = vcmp.lt.s32.totalorder %v4014_v50, 1  ;;  %vm869_vm4 = vcmp.ge.s32.totalorder %v4028_v57, 1  ;;  %v853_v23 = vrot.slane %v4004_v45, 7 }
 0x238   : > { %849 = vst [vmem:[#allocation3 + $0x8] sm:$0xff] %v845_v12  ;;  %v847_v20 = vpack.c.bf16 %v817_v14, %v841_v17  ;;  %850 = vst [vmem:[#allocation3 + $0x30] sm:$0xff] %v846_v16  ;;  %v865_v22 = vsel %vm860_vm3, %v852_v18, %v854_v19  ;;  %v855_v24 = vrot.slane %v4008_v47, 7  ;;  %v859_v25 = vrot.slane %v4022_v54, 7 }
 0x239   : > { %v867_v26 = vsel %vm860_vm3, %v858_v21, %v852_v18  ;;  %v856_v27 = vrot.slane %v4010_v48, 7  ;;  %vm871_vm5 = vcmp.ge.s32.totalorder %v4030_v58, 1  ;;  %v857_v28 = vrot.slane %v4020_v53, 7 }
 0x23a   : > { %851 = vst [vmem:[#allocation3 + $0x38] sm:$0xff] %v847_v20  ;;  %v881_v29 = vsel %vm869_vm4, %v867_v26, 0.0  ;;  %v866_v30 = vsel %vm860_vm3, %v853_v23, %v855_v24  ;;  %v868_v31 = vsel %vm860_vm3, %v859_v25, %v853_v23 }
 0x23b   : > { %v889_v32 = vpack.c.bf16 %v865_v22, %v881_v29  ;;  %v882_v33 = vsel %vm869_vm4, %v868_v31, 0.0  ;;  %v861_v34 = vsel %vm860_vm3, %v856_v27, %v858_v21  ;;  %v863_v35 = vsel %vm860_vm3, %v854_v19, %v856_v27 }
 0x23c   : > { %v890_v36 = vpack.c.bf16 %v866_v30, %v882_v33  ;;  %v885_v37 = vsel %vm871_vm5, %v863_v35, 0.0  ;;  %v862_v38 = vsel %vm860_vm3, %v857_v28, %v859_v25  ;;  %v864_v39 = vsel %vm860_vm3, %v855_v24, %v857_v28 }
 0x23d   : > { %893 = vst [vmem:[#allocation3 + $0x10] sm:$0xff] %v889_v32  ;;  %v891_v40 = vpack.c.bf16 %v861_v34, %v885_v37  ;;  %v886_v41 = vsel %vm871_vm5, %v864_v39, 0.0 }
 0x23e   : > { %894 = vst [vmem:[#allocation3 + $0x18] sm:$0xff] %v890_v36  ;;  %v892_v44 = vpack.c.bf16 %v862_v38, %v886_v41 }
 0x23f   : > { %895 = vst [vmem:[#allocation3 + $0x40] sm:$0xff] %v891_v40 }
 0x240   : > { %896 = vst [vmem:[#allocation3 + $0x48] sm:$0xff] %v892_v44 }
 0x241 PF: > { %s4460_s1 = sld [smem:[#allocation27_spill]] }
 0x247   : > { %p2590_p5 = scmp.ne.s32.totalorder %s4460_s1, 1 }
 0x248   : > { %v901_v46 = vrot.slane (!%p2590_p5), %v4000_v42, 4  ;;  %v903_v51 = vrot.slane (!%p2590_p5), %v4002_v43, 4  ;;  %v907_v52 = vrot.slane (!%p2590_p5), %v4012_v49, 4  ;;  %vm909_vm6 = vcmp.lt.s32.totalorder (!%p2590_p5), %v4014_v50, 4 }
 0x249   : > { %900 = sbr.rel (%p2590_p5) target bundleno = 601 (0x259), region = 104  ;;  %vm918_vm7 = vcmp.ge.s32.totalorder (!%p2590_p5), %v4028_v57, 4  ;;  %v902_v55 = vrot.slane (!%p2590_p5), %v4004_v45, 4  ;;  %v904_v56 = vrot.slane (!%p2590_p5), %v4008_v47, 4  ;;  %v908_v59 = vrot.slane (!%p2590_p5), %v4022_v54, 4 }
 0x24a   : > { %v914_v60 = vsel (!%p2590_p5), %vm909_vm6, %v901_v46, %v903_v51  ;;  %v916_v61 = vsel (!%p2590_p5), %vm909_vm6, %v907_v52, %v901_v46  ;;  %v905_v62 = vrot.slane (!%p2590_p5), %v4010_v48, 4  ;;  %vm920_vm8 = vcmp.ge.s32.totalorder (!%p2590_p5), %v4030_v58, 4 }
 0x24b   : > { %v930_v63 = vsel (!%p2590_p5), %vm918_vm7, %v916_v61, 0.0  ;;  %v915_v0 = vsel (!%p2590_p5), %vm909_vm6, %v902_v55, %v904_v56  ;;  %v917_v1 = vsel (!%p2590_p5), %vm909_vm6, %v908_v59, %v902_v55  ;;  %v906_v2 = vrot.slane (!%p2590_p5), %v4020_v53, 4 }
 0x24c   : > { %v938_v3 = vpack.c.bf16 (!%p2590_p5), %v914_v60, %v930_v63  ;;  %v931_v4 = vsel (!%p2590_p5), %vm918_vm7, %v917_v1, 0.0  ;;  %v910_v5 = vsel (!%p2590_p5), %vm909_vm6, %v905_v62, %v907_v52  ;;  %v912_v6 = vsel (!%p2590_p5), %vm909_vm6, %v903_v51, %v905_v62 }
 0x24d   : > { %v939_v7 = vpack.c.bf16 (!%p2590_p5), %v915_v0, %v931_v4  ;;  %v934_v8 = vsel (!%p2590_p5), %vm920_vm8, %v912_v6, 0.0  ;;  %v911_v9 = vsel (!%p2590_p5), %vm909_vm6, %v906_v2, %v908_v59  ;;  %v913_v10 = vsel (!%p2590_p5), %vm909_vm6, %v904_v56, %v906_v2 }
 0x24e   : > { %942 = vst [vmem:[#allocation3] sm:$0xff] (!%p2590_p5), %v938_v3  ;;  %v940_v11 = vpack.c.bf16 (!%p2590_p5), %v910_v5, %v934_v8  ;;  %v935_v12 = vsel (!%p2590_p5), %vm920_vm8, %v913_v10, 0.0  ;;  %v946_v13 = vrot.slane (!%p2590_p5), %v4000_v42, 6  ;;  %v948_v14 = vrot.slane (!%p2590_p5), %v4002_v43, 6 }
 0x24f   : > { %943 = vst [vmem:[#allocation3 + $0x8] sm:$0xff] (!%p2590_p5), %v939_v7  ;;  %v941_v15 = vpack.c.bf16 (!%p2590_p5), %v911_v9, %v935_v12  ;;  %v952_v16 = vrot.slane (!%p2590_p5), %v4012_v49, 6  ;;  %vm954_vm9 = vcmp.lt.s32.totalorder (!%p2590_p5), %v4014_v50, 2  ;;  %vm963_vm10 = vcmp.ge.s32.totalorder (!%p2590_p5), %v4028_v57, 2 }
 0x250   : > { %944 = vst [vmem:[#allocation3 + $0x30] sm:$0xff] %v940_v11  ;;  %v959_v17 = vsel %vm954_vm9, %v946_v13, %v948_v14  ;;  %v947_v18 = vrot.slane %v4004_v45, 6  ;;  %v949_v19 = vrot.slane %v4008_v47, 6  ;;  %v953_v20 = vrot.slane %v4022_v54, 6 }
 0x251   : > { %945 = vst [vmem:[#allocation3 + $0x38] sm:$0xff] %v941_v15  ;;  %v961_v21 = vsel %vm954_vm9, %v952_v16, %v946_v13  ;;  %v950_v22 = vrot.slane %v4010_v48, 6  ;;  %vm965_vm11 = vcmp.ge.s32.totalorder %v4030_v58, 2  ;;  %v951_v23 = vrot.slane %v4020_v53, 6 }
 0x252   : > { %v975_v24 = vsel %vm963_vm10, %v961_v21, 0.0  ;;  %v960_v25 = vsel %vm954_vm9, %v947_v18, %v949_v19  ;;  %v962_v26 = vsel %vm954_vm9, %v953_v20, %v947_v18 }
 0x253   : > { %v983_v27 = vpack.c.bf16 %v959_v17, %v975_v24  ;;  %v976_v28 = vsel %vm963_vm10, %v962_v26, 0.0  ;;  %v955_v29 = vsel %vm954_vm9, %v950_v22, %v952_v16  ;;  %v957_v30 = vsel %vm954_vm9, %v948_v14, %v950_v22 }
 0x254   : > { %v984_v31 = vpack.c.bf16 %v960_v25, %v976_v28  ;;  %v979_v32 = vsel %vm965_vm11, %v957_v30, 0.0  ;;  %v956_v33 = vsel %vm954_vm9, %v951_v23, %v953_v20  ;;  %v958_v34 = vsel %vm954_vm9, %v949_v19, %v951_v23 }
 0x255   : > { %987 = vst [vmem:[#allocation3 + $0x10] sm:$0xff] %v983_v27  ;;  %v985_v35 = vpack.c.bf16 %v955_v29, %v979_v32  ;;  %v980_v36 = vsel %vm965_vm11, %v958_v34, 0.0 }
 0x256   : > { %988 = vst [vmem:[#allocation3 + $0x18] sm:$0xff] %v984_v31  ;;  %v986_v37 = vpack.c.bf16 %v956_v33, %v980_v36 }
 0x257   : > { %989 = vst [vmem:[#allocation3 + $0x40] sm:$0xff] %v985_v35 }
 0x258   : > { %990 = vst [vmem:[#allocation3 + $0x48] sm:$0xff] %v986_v37 }
 0x259 PF: > { %s4461_s7 = sld [smem:[#allocation27_spill]] }
 0x25f   : > { %p2591_p9 = scmp.ne.s32.totalorder %s4461_s7, 2 }
 0x260   : > { %v1023_v38 = vrot.slane (!%p2591_p9), %v4000_v42, 4  ;;  %v1025_v39 = vrot.slane (!%p2591_p9), %v4002_v43, 4  ;;  %v1029_v40 = vrot.slane (!%p2591_p9), %v4012_v49, 4  ;;  %v3579_v41 = vmov (!%p2591_p9), 0.0  }
 0x261   : > { %994 = sbr.rel (%p2591_p9) target bundleno = 619 (0x26b), region = 108  ;;  %v1015_v44 = vpack.c.bf16 (!%p2591_p9), %v4000_v42, %v3579_v41  ;;  %v1016_v46 = vpack.c.bf16 (!%p2591_p9), %v4004_v45, %v3579_v41  ;;  %v1017_v51 = vpack.c.bf16 (!%p2591_p9), %v4010_v48, %v3579_v41  ;;  %v1018_v52 = vpack.c.bf16 (!%p2591_p9), %v4020_v53, %v3579_v41 }
 0x262   : > { %vm1031_vm12 = vcmp.lt.s32.totalorder (!%p2591_p9), %v4014_v50, 4  ;;  %vm1040_vm13 = vcmp.ge.s32.totalorder (!%p2591_p9), %v4028_v57, 4  ;;  %v1024_v55 = vrot.slane (!%p2591_p9), %v4004_v45, 4  ;;  %v1026_v56 = vrot.slane (!%p2591_p9), %v4008_v47, 4 }
 0x263   : > { %1019 = vst [vmem:[#allocation3] sm:$0xff] (!%p2591_p9), %v1015_v44  ;;  %1020 = vst [vmem:[#allocation3 + $0x8] sm:$0xff] (!%p2591_p9), %v1016_v46  ;;  %v1036_v59 = vsel (!%p2591_p9), %vm1031_vm12, %v1023_v38, %v1025_v39  ;;  %v1038_v60 = vsel (!%p2591_p9), %vm1031_vm12, %v1029_v40, %v1023_v38  ;;  %v1030_v61 = vrot.slane (!%p2591_p9), %v4022_v54, 4  ;;  %v1027_v62 = vrot.slane (!%p2591_p9), %v4010_v48, 4 }
 0x264   : > { %1021 = vst [vmem:[#allocation3 + $0x30] sm:$0xff] (!%p2591_p9), %v1017_v51  ;;  %1022 = vst [vmem:[#allocation3 + $0x38] sm:$0xff] (!%p2591_p9), %v1018_v52  ;;  %v1052_v63 = vsel (!%p2591_p9), %vm1040_vm13, %v1038_v60, 0.0  ;;  %v1037_v0 = vsel (!%p2591_p9), %vm1031_vm12, %v1024_v55, %v1026_v56  ;;  %vm1042_vm14 = vcmp.ge.s32.totalorder (!%p2591_p9), %v4030_v58, 4  ;;  %v1028_v1 = vrot.slane (!%p2591_p9), %v4020_v53, 4 }
 0x265   : > { %v1060_v2 = vpack.c.bf16 (!%p2591_p9), %v1036_v59, %v1052_v63  ;;  %v1039_v3 = vsel (!%p2591_p9), %vm1031_vm12, %v1030_v61, %v1024_v55  ;;  %v1032_v4 = vsel (!%p2591_p9), %vm1031_vm12, %v1027_v62, %v1029_v40  ;;  %v1034_v5 = vsel (!%p2591_p9), %vm1031_vm12, %v1025_v39, %v1027_v62 }
 0x266   : > { %v1053_v6 = vsel (!%p2591_p9), %vm1040_vm13, %v1039_v3, 0.0  ;;  %v1056_v7 = vsel (!%p2591_p9), %vm1042_vm14, %v1034_v5, 0.0  ;;  %v1033_v8 = vsel (!%p2591_p9), %vm1031_vm12, %v1028_v1, %v1030_v61  ;;  %v1035_v58 = vsel (!%p2591_p9), %vm1031_vm12, %v1026_v56, %v1028_v1 }
 0x267   : > { %1064 = vst [vmem:[#allocation3 + $0x10] sm:$0xff] (!%p2591_p9), %v1060_v2  ;;  %v1061_v9 = vpack.c.bf16 (!%p2591_p9), %v1037_v0, %v1053_v6  ;;  %v1062_v10 = vpack.c.bf16 (!%p2591_p9), %v1032_v4, %v1056_v7  ;;  %v1057_v11 = vsel (!%p2591_p9), %vm1042_vm14, %v1035_v58, 0.0 }
 0x268   : > { %v1063_v12 = vpack.c.bf16 %v1033_v8, %v1057_v11 }
 0x269   : > { %1065 = vst [vmem:[#allocation3 + $0x18] sm:$0xff] %v1061_v9  ;;  %1066 = vst [vmem:[#allocation3 + $0x40] sm:$0xff] %v1062_v10 }
 0x26a   : > { %1067 = vst [vmem:[#allocation3 + $0x48] sm:$0xff] %v1063_v12 }
 0x26b PF: > { %s4462_s28 = sld [smem:[#allocation27_spill]] }
 0x271   : > { %p2592_p10 = scmp.ne.s32.totalorder %s4462_s28, 3 }
 0x272   : > { %v3580_v57 = vmov (!%p2592_p10), 0   ;;  %v3581_v13 = vmov (!%p2592_p10), 0.0  }
 0x273   : > { %1071 = sbr.rel (%p2592_p10) target bundleno = 634 (0x27a), region = 112  ;;  %1072 = vst [vmem:[#allocation3] sm:$0xff] (!%p2592_p10), %v3580_v57  ;;  %1073 = vst [vmem:[#allocation3 + $0x8] sm:$0xff] (!%p2592_p10), %v3580_v57  ;;  %v1096_v14 = vpack.c.bf16 (!%p2592_p10), %v4000_v42, %v3581_v13  ;;  %v1097_v15 = vpack.c.bf16 (!%p2592_p10), %v4004_v45, %v3581_v13  ;;  %v1098_v16 = vpack.c.bf16 (!%p2592_p10), %v4010_v48, %v3581_v13 }
 0x274   : > { %1074 = vst [vmem:[#allocation3 + $0x30] sm:$0xff] (!%p2592_p10), %v3580_v57  ;;  %1075 = vst [vmem:[#allocation3 + $0x38] sm:$0xff] (!%p2592_p10), %v3580_v57  ;;  %v1099_v17 = vpack.c.bf16 (!%p2592_p10), %v4020_v53, %v3581_v13 }
 0x275   : > { %1100 = vst [vmem:[#allocation3 + $0x10] sm:$0xff] (!%p2592_p10), %v1096_v14  ;;  %1101 = vst [vmem:[#allocation3 + $0x18] sm:$0xff] (!%p2592_p10), %v1097_v15 }
 0x276   : > { %1102 = vst [vmem:[#allocation3 + $0x40] sm:$0xff] (!%p2592_p10), %v1098_v16  ;;  %1103 = vst [vmem:[#allocation3 + $0x48] sm:$0xff] (!%p2592_p10), %v1099_v17 }
 0x27a PF: > { %s4463_s16 = sld [smem:[#allocation27_spill]] }
 0x280   : > { %p2593_p0 = scmp.ne.s32.totalorder %s4463_s16, 4 }
 0x281   : > { %v3582_v18 = vmov (!%p2593_p0), 0  }
 0x282   : > { %1107 = sbr.rel (%p2593_p0) target bundleno = 649 (0x289), region = 116  ;;  %1108 = vst [vmem:[#allocation3] sm:$0xff] (!%p2593_p0), %v3582_v18  ;;  %1109 = vst [vmem:[#allocation3 + $0x8] sm:$0xff] (!%p2593_p0), %v3582_v18 }
 0x283   : > { %1110 = vst [vmem:[#allocation3 + $0x30] sm:$0xff] (!%p2593_p0), %v3582_v18  ;;  %1111 = vst [vmem:[#allocation3 + $0x38] sm:$0xff] (!%p2593_p0), %v3582_v18 }
 0x284   : > { %1112 = vst [vmem:[#allocation3 + $0x10] sm:$0xff] (!%p2593_p0), %v3582_v18  ;;  %1113 = vst [vmem:[#allocation3 + $0x18] sm:$0xff] (!%p2593_p0), %v3582_v18 }
 0x285   : > { %1114 = vst [vmem:[#allocation3 + $0x40] sm:$0xff] (!%p2593_p0), %v3582_v18  ;;  %1115 = vst [vmem:[#allocation3 + $0x48] sm:$0xff] (!%p2593_p0), %v3582_v18 }
 0x289 PF: > { %v2999_v19 = vld [vmem:[%s3977_s24 + $0x104] ss:$8 sps:$4 sm:$0xff]   ;;  %v3001_v20 = vld [vmem:[%s3977_s24 + $0x100] ss:$8 sps:$4 sm:$0xff]   ;;  %v3002_v21 = vld [vmem:[%s3977_s24 + $0x114] ss:$8 sps:$4 sm:$0xff]  }
 0x28a   : > { %1769 = vmatprep.subr.bf16.mxu0 %v2999_v19  ;;  %v3004_v22 = vld [vmem:[%s3977_s24 + $0x110] ss:$8 sps:$4 sm:$0xff]   ;;  %v3005_v23 = vld [vmem:[%s3977_s24 + $0x124] ss:$8 sps:$4 sm:$0xff]   ;;  %v3007_v24 = vld [vmem:[%s3977_s24 + $0x120] ss:$8 sps:$4 sm:$0xff]  }
 0x28b   : > { %1770 = vmatpush1.bf16.msra.mxu0 %v3001_v20  ;;  %v3008_v25 = vld [vmem:[%s3977_s24 + $0x134] ss:$8 sps:$4 sm:$0xff]   ;;  %v3010_v26 = vld [vmem:[%s3977_s24 + $0x130] ss:$8 sps:$4 sm:$0xff]   ;;  %v3011_v27 = vld [vmem:[%s3977_s24 + $0x144] ss:$8 sps:$4 sm:$0xff]  }
 0x28c   : > { %1771 = vmatprep.subr.bf16.mxu0 %v3002_v21  ;;  %v3013_v28 = vld [vmem:[%s3977_s24 + $0x140] ss:$8 sps:$4 sm:$0xff]   ;;  %v3014_v29 = vld [vmem:[%s3977_s24 + $0x154] ss:$8 sps:$4 sm:$0xff]   ;;  %v3016_v30 = vld [vmem:[%s3977_s24 + $0x150] ss:$8 sps:$4 sm:$0xff]  }
 0x28d   : > { %v3017_v31 = vld [vmem:[%s3977_s24 + $0x164] ss:$8 sps:$4 sm:$0xff]   ;;  %v3046_v33 = vld [vmem:[%s3977_s24] ss:$8 sps:$4 sm:$0xff]   ;;  %v3020_v35 = vld [vmem:[%s3977_s24 + $0x174] ss:$8 sps:$4 sm:$0xff]  }
 0x28e   : > { %v3044_v32 = vld [vmem:[%s3977_s24 + $0x4] ss:$8 sps:$4 sm:$0xff]   ;;  %v3019_v34 = vld [vmem:[%s3977_s24 + $0x160] ss:$8 sps:$4 sm:$0xff]   ;;  %v3050_v36 = vld [vmem:[%s3977_s24 + $0x14] ss:$8 sps:$4 sm:$0xff]  }
 0x28f   : > { %1772 = vmatpush1.bf16.msra.mxu0 %v3004_v22  ;;  %1716 = vmatprep.subr.bf16.mxu1 %v3044_v32  ;;  %v3052_v37 = vld [vmem:[%s3977_s24 + $0x10] ss:$8 sps:$4 sm:$0xff]   ;;  %v1119_v38 = vld [vmem:[#allocation3 + $0x18] sm:$0xff]  ;;  %v3062_v46 = vld [vmem:[%s3977_s24 + $0x34] ss:$8 sps:$4 sm:$0xff]  }
 0x290   : > { %1773 = vmatprep.subr.bf16.mxu0 %v3005_v23  ;;  %1717 = vmatpush1.bf16.msra.mxu1 %v3046_v33  ;;  %v3022_v39 = vld [vmem:[%s3977_s24 + $0x170] ss:$8 sps:$4 sm:$0xff]   ;;  %v3056_v40 = vld [vmem:[%s3977_s24 + $0x24] ss:$8 sps:$4 sm:$0xff]   ;;  %v3058_v41 = vld [vmem:[%s3977_s24 + $0x20] ss:$8 sps:$4 sm:$0xff]  }
 0x291   : > { %1718 = vmatprep.subr.bf16.mxu1 %v3050_v36  ;;  %1801 = vmatprep.mubr.bf16.mxu0 %v1119_v38  ;;  %v3023_v44 = vld [vmem:[%s3977_s24 + $0x184] ss:$8 sps:$4 sm:$0xff]   ;;  %v3025_v51 = vld [vmem:[%s3977_s24 + $0x180] ss:$8 sps:$4 sm:$0xff]   ;;  %v3064_v52 = vld [vmem:[%s3977_s24 + $0x30] ss:$8 sps:$4 sm:$0xff]  }
 0x292   : > { %v3026_v55 = vld [vmem:[%s3977_s24 + $0x194] ss:$8 sps:$4 sm:$0xff]   ;;  %v3068_v56 = vld [vmem:[%s3977_s24 + $0x44] ss:$8 sps:$4 sm:$0xff]   ;;  %v3028_v59 = vld [vmem:[%s3977_s24 + $0x190] ss:$8 sps:$4 sm:$0xff]  }
 0x293   : > { %1774 = vmatpush1.bf16.msra.mxu0 %v3007_v24  ;;  %v3070_v60 = vld [vmem:[%s3977_s24 + $0x40] ss:$8 sps:$4 sm:$0xff]   ;;  %v3029_v61 = vld [vmem:[%s3977_s24 + $0x1a4] ss:$8 sps:$4 sm:$0xff]   ;;  %v3074_v62 = vld [vmem:[%s3977_s24 + $0x54] ss:$8 sps:$4 sm:$0xff]  }
 0x294   : > { %1775 = vmatprep.subr.bf16.mxu0 %v3008_v25  ;;  %1719 = vmatpush1.bf16.msra.mxu1 %v3052_v37  ;;  %v3031_v63 = vld [vmem:[%s3977_s24 + $0x1a0] ss:$8 sps:$4 sm:$0xff]   ;;  %v3076_v0 = vld [vmem:[%s3977_s24 + $0x50] ss:$8 sps:$4 sm:$0xff]   ;;  %v3032_v1 = vld [vmem:[%s3977_s24 + $0x1b4] ss:$8 sps:$4 sm:$0xff]  }
 0x295   : > { %1720 = vmatprep.subr.bf16.mxu1 %v3056_v40  ;;  %v3080_v2 = vld [vmem:[%s3977_s24 + $0x64] ss:$8 sps:$4 sm:$0xff]   ;;  %v3034_v3 = vld [vmem:[%s3977_s24 + $0x1b0] ss:$8 sps:$4 sm:$0xff]   ;;  %v3082_v4 = vld [vmem:[%s3977_s24 + $0x60] ss:$8 sps:$4 sm:$0xff]  }
 0x296   : > { %v3035_v5 = vld [vmem:[%s3977_s24 + $0x1c4] ss:$8 sps:$4 sm:$0xff]   ;;  %v3086_v6 = vld [vmem:[%s3977_s24 + $0x74] ss:$8 sps:$4 sm:$0xff]   ;;  %v3037_v7 = vld [vmem:[%s3977_s24 + $0x1c0] ss:$8 sps:$4 sm:$0xff]  }
 0x297   : > { %1776 = vmatpush1.bf16.msra.mxu0 %v3010_v26  ;;  %v3088_v8 = vld [vmem:[%s3977_s24 + $0x70] ss:$8 sps:$4 sm:$0xff]   ;;  %v3038_v58 = vld [vmem:[%s3977_s24 + $0x1d4] ss:$8 sps:$4 sm:$0xff]   ;;  %v3092_v9 = vld [vmem:[%s3977_s24 + $0x84] ss:$8 sps:$4 sm:$0xff]  }
 0x298   : > { %1777 = vmatprep.subr.bf16.mxu0 %v3011_v27  ;;  %1721 = vmatpush1.bf16.msra.mxu1 %v3058_v41  ;;  %v3040_v10 = vld [vmem:[%s3977_s24 + $0x1d0] ss:$8 sps:$4 sm:$0xff]   ;;  %v3094_v11 = vld [vmem:[%s3977_s24 + $0x80] ss:$8 sps:$4 sm:$0xff]   ;;  %v3041_v12 = vld [vmem:[%s3977_s24 + $0x1e4] ss:$8 sps:$4 sm:$0xff]  }
 0x299   : > { %1722 = vmatprep.subr.bf16.mxu1 %v3062_v46  ;;  %v3098_v57 = vld [vmem:[%s3977_s24 + $0x94] ss:$8 sps:$4 sm:$0xff]   ;;  %v3043_v13 = vld [vmem:[%s3977_s24 + $0x1e0] ss:$8 sps:$4 sm:$0xff]   ;;  %v3100_v14 = vld [vmem:[%s3977_s24 + $0x90] ss:$8 sps:$4 sm:$0xff]  }
 0x29a   : > { %v3047_v15 = vld [vmem:[%s3977_s24 + $0x1f4] ss:$8 sps:$4 sm:$0xff]   ;;  %v3104_v16 = vld [vmem:[%s3977_s24 + $0xa4] ss:$8 sps:$4 sm:$0xff]   ;;  %v3049_v17 = vld [vmem:[%s3977_s24 + $0x1f0] ss:$8 sps:$4 sm:$0xff]  }
 0x29b   : > { %1778 = vmatpush1.bf16.msra.mxu0 %v3013_v28  ;;  %v3106_v18 = vld [vmem:[%s3977_s24 + $0xa0] ss:$8 sps:$4 sm:$0xff]   ;;  %v3055_v19 = vld [vmem:[%s3977_s24 + $0x204] ss:$8 sps:$4 sm:$0xff]   ;;  %v3110_v20 = vld [vmem:[%s3977_s24 + $0xb4] ss:$8 sps:$4 sm:$0xff]  }
 0x29c   : > { %1779 = vmatprep.subr.bf16.mxu0 %v3014_v29  ;;  %1723 = vmatpush1.bf16.msra.mxu1 %v3064_v52  ;;  %v3053_v21 = vld [vmem:[%s3977_s24 + $0x200] ss:$8 sps:$4 sm:$0xff]   ;;  %v3061_v23 = vld [vmem:[%s3977_s24 + $0x214] ss:$8 sps:$4 sm:$0xff]   ;;  %v3112_v24 = vld [vmem:[%s3977_s24 + $0xb0] ss:$8 sps:$4 sm:$0xff]  }
 0x29d   : > { %1724 = vmatprep.subr.bf16.mxu1 %v3068_v56  ;;  %v1118_v22 = vld [vmem:[#allocation3 + $0x10] sm:$0xff]  ;;  %v1117_v26 = vld [vmem:[#allocation3 + $0x8] sm:$0xff]  ;;  %v3145_v52 = vld [vmem:[%s3985_s21 + $0x4] ss:$8 sps:$4 sm:$0xff]  }
 0x29e   : > { %v3116_v25 = vld [vmem:[%s3977_s24 + $0xc4] ss:$8 sps:$4 sm:$0xff]   ;;  %1748 = vmatprep.mubr.bf16.mxu1 %v1117_v26  ;;  %v1125_v27 = vld [vmem:[#allocation3 + $0x48] sm:$0xff]  ;;  %v3065_v32 = vld [vmem:[%s3977_s24 + $0x220] ss:$8 sps:$4 sm:$0xff]  }
 0x29f   : > { %1780 = vmatpush1.bf16.msra.mxu0 %v3016_v30  ;;  %v3059_v28 = vld [vmem:[%s3977_s24 + $0x210] ss:$8 sps:$4 sm:$0xff]   ;;  %v3067_v29 = vld [vmem:[%s3977_s24 + $0x224] ss:$8 sps:$4 sm:$0xff]   ;;  %v3118_v30 = vld [vmem:[%s3977_s24 + $0xc0] ss:$8 sps:$4 sm:$0xff]  }
 0x2a0   : > { %1781 = vmatprep.subr.bf16.mxu0 %v3017_v31  ;;  %1725 = vmatpush1.bf16.msra.mxu1 %v3070_v60  ;;  %v3122_v31 = vld [vmem:[%s3977_s24 + $0xd4] ss:$8 sps:$4 sm:$0xff]   ;;  %v3128_v36 = vld [vmem:[%s3977_s24 + $0xe4] ss:$8 sps:$4 sm:$0xff]   ;;  %v3071_v37 = vld [vmem:[%s3977_s24 + $0x230] ss:$8 sps:$4 sm:$0xff]  }
 0x2a1   : > { %1726 = vmatprep.subr.bf16.mxu1 %v3074_v62  ;;  %v3073_v33 = vld [vmem:[%s3977_s24 + $0x234] ss:$8 sps:$4 sm:$0xff]   ;;  %v3130_v40 = vld [vmem:[%s3977_s24 + $0xe0] ss:$8 sps:$4 sm:$0xff]   ;;  %v3091_v56 = vld [vmem:[%s3977_s24 + $0x264] ss:$8 sps:$4 sm:$0xff]  }
 0x2a2   : > { %v1121_v38 = vld [vmem:[#allocation3 + $0x28] sm:$0xff]  ;;  %v1123_v60 = vld [vmem:[#allocation3 + $0x38] sm:$0xff] }
 0x2a3   : > { %1782 = vmatpush1.bf16.msra.mxu0 %v3019_v34  ;;  %v3124_v34 = vld [vmem:[%s3977_s24 + $0xd0] ss:$8 sps:$4 sm:$0xff]   ;;  %v3134_v41 = vld [vmem:[%s3977_s24 + $0xf4] ss:$8 sps:$4 sm:$0xff]  }
 0x2a4   : > { %1783 = vmatprep.subr.bf16.mxu0 %v3020_v35  ;;  %1727 = vmatpush1.bf16.msra.mxu1 %v3076_v0  ;;  %v1124_v35 = vld [vmem:[#allocation3 + $0x40] sm:$0xff]  ;;  %v3148_v62 = vld [vmem:[%s3985_s21 + $0x14] ss:$8 sps:$4 sm:$0xff]  }
 0x2a5   : > { %1728 = vmatprep.subr.bf16.mxu1 %v3080_v2  ;;  %v3085_v46 = vld [vmem:[%s3977_s24 + $0x254] ss:$8 sps:$4 sm:$0xff]   ;;  %v3151_v2 = vld [vmem:[%s3985_s21 + $0x24] ss:$8 sps:$4 sm:$0xff]  }
 0x2a6   : > { %v3097_v0 = vld [vmem:[%s3977_s24 + $0x274] ss:$8 sps:$4 sm:$0xff]   ;;  %v3131_v26 = vld [vmem:[%s3977_s24 + $0x2d0] ss:$8 sps:$4 sm:$0xff]  }
 0x2a7   : > { %1784 = vmatpush1.bf16.msra.mxu0 %v3022_v39  ;;  %v3079_v39 = vld [vmem:[%s3977_s24 + $0x244] ss:$8 sps:$4 sm:$0xff]  }
 0x2a8   : > { %1785 = vmatprep.subr.bf16.mxu0 %v3023_v44  ;;  %1729 = vmatpush1.bf16.msra.mxu1 %v3082_v4  ;;  %v3077_v44 = vld [vmem:[%s3977_s24 + $0x240] ss:$8 sps:$4 sm:$0xff]  }
 0x2a9   : > { %1730 = vmatprep.subr.bf16.mxu1 %v3086_v6  ;;  %v1122_v4 = vld [vmem:[#allocation3 + $0x30] sm:$0xff] }
 0x2aa   : > { %v3149_v6 = vld [vmem:[%s3985_s21 + $0x20] ss:$8 sps:$4 sm:$0xff]  }
 0x2ab   : > { %1786 = vmatpush1.bf16.msra.mxu0 %v3025_v51  ;;  %v3136_v51 = vld [vmem:[%s3977_s24 + $0xf0] ss:$8 sps:$4 sm:$0xff]  }
 0x2ac   : > { %1787 = vmatprep.subr.bf16.mxu0 %v3026_v55  ;;  %1731 = vmatpush1.bf16.msra.mxu1 %v3088_v8  ;;  %v3083_v55 = vld [vmem:[%s3977_s24 + $0x250] ss:$8 sps:$4 sm:$0xff]   ;;  %v3101_v8 = vld [vmem:[%s3977_s24 + $0x280] ss:$8 sps:$4 sm:$0xff]  }
 0x2ad   : > { %1732 = vmatprep.subr.bf16.mxu1 %v3092_v9  ;;  %v3152_v9 = vld [vmem:[%s3985_s21 + $0x30] ss:$8 sps:$4 sm:$0xff]  }
 0x2af   : > { %1788 = vmatpush1.bf16.msra.mxu0 %v3028_v59  ;;  %v1116_v59 = vld [vmem:[#allocation3] sm:$0xff] }
 0x2b0   : > { %1789 = vmatprep.subr.bf16.mxu0 %v3029_v61  ;;  %1733 = vmatpush1.bf16.msra.mxu1 %v3094_v11  ;;  %v3143_v61 = vld [vmem:[%s3985_s21] ss:$8 sps:$4 sm:$0xff]   ;;  %v3107_v11 = vld [vmem:[%s3977_s24 + $0x290] ss:$8 sps:$4 sm:$0xff]  }
 0x2b1   : > { %1734 = vmatprep.subr.bf16.mxu1 %v3098_v57  ;;  %v3155_v57 = vld [vmem:[%s3985_s21 + $0x40] ss:$8 sps:$4 sm:$0xff]  }
 0x2b3   : > { %1790 = vmatpush1.bf16.msra.mxu0 %v3031_v63  ;;  %v3089_v63 = vld [vmem:[%s3977_s24 + $0x260] ss:$8 sps:$4 sm:$0xff]  }
 0x2b4   : > { %1791 = vmatprep.subr.bf16.mxu0 %v3032_v1  ;;  %1735 = vmatpush1.bf16.msra.mxu1 %v3100_v14  ;;  %v3146_v1 = vld [vmem:[%s3985_s21 + $0x10] ss:$8 sps:$4 sm:$0xff]   ;;  %v3113_v14 = vld [vmem:[%s3977_s24 + $0x2a0] ss:$8 sps:$4 sm:$0xff]  }
 0x2b5   : > { %1736 = vmatprep.subr.bf16.mxu1 %v3104_v16  ;;  %v3158_v16 = vld [vmem:[%s3985_s21 + $0x50] ss:$8 sps:$4 sm:$0xff]  }
 0x2b7   : > { %1792 = vmatpush1.bf16.msra.mxu0 %v3034_v3  ;;  %v3095_v3 = vld [vmem:[%s3977_s24 + $0x270] ss:$8 sps:$4 sm:$0xff]  }
 0x2b8   : > { %1793 = vmatprep.subr.bf16.mxu0 %v3035_v5  ;;  %1737 = vmatpush1.bf16.msra.mxu1 %v3106_v18  ;;  %v3103_v5 = vld [vmem:[%s3977_s24 + $0x284] ss:$8 sps:$4 sm:$0xff]   ;;  %v3119_v18 = vld [vmem:[%s3977_s24 + $0x2b0] ss:$8 sps:$4 sm:$0xff]  }
 0x2b9   : > { %1738 = vmatprep.subr.bf16.mxu1 %v3110_v20  ;;  %v3161_v20 = vld [vmem:[%s3985_s21 + $0x60] ss:$8 sps:$4 sm:$0xff]  }
 0x2bb   : > { %1794 = vmatpush1.bf16.msra.mxu0 %v3037_v7  ;;  %v3154_v7 = vld [vmem:[%s3985_s21 + $0x34] ss:$8 sps:$4 sm:$0xff]  }
 0x2bc   : > { %1795 = vmatprep.subr.bf16.mxu0 %v3038_v58  ;;  %1739 = vmatpush1.bf16.msra.mxu1 %v3112_v24  ;;  %v3109_v58 = vld [vmem:[%s3977_s24 + $0x294] ss:$8 sps:$4 sm:$0xff]  }
 0x2bd   : > { %1740 = vmatprep.subr.bf16.mxu1 %v3116_v25  ;;  %v3164_v24 = vld [vmem:[%s3985_s21 + $0x70] ss:$8 sps:$4 sm:$0xff]   ;;  %v3169_v25 = vld [vmem:[%s3985_s21 + $0x84] ss:$8 sps:$4 sm:$0xff]  }
 0x2bf   : > { %1796 = vmatpush1.bf16.msra.mxu0 %v3040_v10  ;;  %v3157_v10 = vld [vmem:[%s3985_s21 + $0x44] ss:$8 sps:$4 sm:$0xff]  }
 0x2c0   : > { %1797 = vmatprep.subr.bf16.mxu0 %v3041_v12  ;;  %1741 = vmatpush1.bf16.msra.mxu1 %v3118_v30  ;;  %v3115_v12 = vld [vmem:[%s3977_s24 + $0x2a4] ss:$8 sps:$4 sm:$0xff]   ;;  %v3137_v30 = vld [vmem:[%s3977_s24 + $0x2e0] ss:$8 sps:$4 sm:$0xff]  }
 0x2c1   : > { %1742 = vmatprep.subr.bf16.mxu1 %v3122_v31  ;;  %v3142_v31 = vld [vmem:[%s3977_s24 + $0x2f4] ss:$8 sps:$4 sm:$0xff]  }
 0x2c3   : > { %1798 = vmatpush1.bf16.msra.mxu0 %v3043_v13  ;;  %v3160_v13 = vld [vmem:[%s3985_s21 + $0x54] ss:$8 sps:$4 sm:$0xff]  }
 0x2c4   : > { %1799 = vmatprep.subr.bf16.mxu0 %v3047_v15  ;;  %1743 = vmatpush1.bf16.msra.mxu1 %v3124_v34  ;;  %v3121_v15 = vld [vmem:[%s3977_s24 + $0x2b4] ss:$8 sps:$4 sm:$0xff]   ;;  %v3140_v34 = vld [vmem:[%s3977_s24 + $0x2f0] ss:$8 sps:$4 sm:$0xff]  }
 0x2c5   : > { %1744 = vmatprep.subr.bf16.mxu1 %v3128_v36  ;;  %v3178_v36 = vld [vmem:[%s3985_s21 + $0xb4] ss:$8 sps:$4 sm:$0xff]  }
 0x2c7   : > { %1800 = vmatpush1.bf16.msra.mxu0 %v3049_v17  ;;  %v3163_v17 = vld [vmem:[%s3985_s21 + $0x64] ss:$8 sps:$4 sm:$0xff]  }
 0x2c8   : > { %1822 = vmatprep.subr.bf16.mxu0 %v3055_v19  ;;  %1745 = vmatpush1.bf16.msra.mxu1 %v3130_v40  ;;  %v3127_v19 = vld [vmem:[%s3977_s24 + $0x2c4] ss:$8 sps:$4 sm:$0xff]  }
 0x2c9   : > { %1746 = vmatprep.subr.bf16.mxu1 %v3134_v41  ;;  %v1126_v40 = vld [vmem:[#allocation3 + $0x50] sm:$0xff] }
 0x2ca   : > { %1802 = vmatmul.mubr.bf16.vlgmr.msra.gmra.mrb[0].mxu0 %v1118_v22  ;;  %v3125_v22 = vld [vmem:[%s3977_s24 + $0x2c0] ss:$8 sps:$4 sm:$0xff]   ;;  %v3179_v41 = vld [vmem:[%s3985_s21 + $0xc0] ss:$8 sps:$4 sm:$0xff]  }
 0x2cb   : > { %1823 = vmatpush1.bf16.msra.mxu0 %v3053_v21  ;;  %1811 = vmatprep.mubr.bf16.mxu0 %v1125_v27  ;;  %v3166_v21 = vld [vmem:[%s3985_s21 + $0x74] ss:$8 sps:$4 sm:$0xff]   ;;  %v3139_v27 = vld [vmem:[%s3977_s24 + $0x2e4] ss:$8 sps:$4 sm:$0xff]  }
 0x2cc   : > { %1824 = vmatprep.subr.bf16.mxu0 %v3061_v23  ;;  %1747 = vmatpush1.bf16.msra.mxu1 %v3136_v51  ;;  %v3133_v23 = vld [vmem:[%s3977_s24 + $0x2d4] ss:$8 sps:$4 sm:$0xff]   ;;  %v3184_v51 = vld [vmem:[%s3985_s21 + $0xd4] ss:$8 sps:$4 sm:$0xff]  }
 0x2cd   : > { %2091 = vmatprep.subr.bf16.mxu1 %v3145_v52  ;;  %v3187_v52 = vld [vmem:[%s3985_s21 + $0xe4] ss:$8 sps:$4 sm:$0xff]  }
 0x2cf   : > { %1825 = vmatpush1.bf16.msra.mxu0 %v3059_v28  ;;  %1749 = vmatmul.mubr.bf16.vlgmr.msra.gmra.mrb[0].mxu1 %v1116_v59  ;;  %v3167_v28 = vld [vmem:[%s3985_s21 + $0x80] ss:$8 sps:$4 sm:$0xff]   ;;  %v3188_v59 = vld [vmem:[%s3985_s21 + $0xf0] ss:$8 sps:$4 sm:$0xff]  }
 0x2d0   : > { %1826 = vmatprep.subr.bf16.mxu0 %v3067_v29  ;;  %1758 = vmatprep.mubr.bf16.mxu1 %v1123_v60  ;;  %v3172_v29 = vld [vmem:[%s3985_s21 + $0x94] ss:$8 sps:$4 sm:$0xff]  }
 0x2d1   : > { %2092 = vmatpush1.bf16.msra.mxu1 %v3143_v61 }
 0x2d2   : > { %1812 = vmatmul.mubr.bf16.gmra.mrb[4].mxu0 %v1124_v35  ;;  %2093 = vmatprep.subr.bf16.mxu1 %v3148_v62  ;;  %v3173_v35 = vld [vmem:[%s3985_s21 + $0xa0] ss:$8 sps:$4 sm:$0xff]  }
 0x2d3   : > { %1827 = vmatpush1.bf16.msra.mxu0 %v3065_v32  ;;  %1854 = vmatprep.mubr.bf16.mxu0 %v1121_v38  ;;  %v3170_v32 = vld [vmem:[%s3985_s21 + $0x90] ss:$8 sps:$4 sm:$0xff]   ;;  %v1127_v38 = vld [vmem:[#allocation3 + $0x58] sm:$0xff] }
 0x2d4   : > { %1828 = vmatprep.subr.bf16.mxu0 %v3073_v33  ;;  %v3175_v33 = vld [vmem:[%s3985_s21 + $0xa4] ss:$8 sps:$4 sm:$0xff]  }
 0x2d5   : > { %2094 = vmatpush1.bf16.msra.mxu1 %v3146_v1 }
 0x2d6   : > { %2095 = vmatprep.subr.bf16.mxu1 %v3151_v2 }
 0x2d7   : > { %1829 = vmatpush1.bf16.msra.mxu0 %v3071_v37  ;;  %1759 = vmatmul.mubr.bf16.gmra.mrb[4].mxu1 %v1122_v4  ;;  %v1120_v37 = vld [vmem:[#allocation3 + $0x20] sm:$0xff]  ;;  %v1228_v4 = vsub.s32 0, %v4014_v50 }
 0x2d8   : > { %1830 = vmatprep.subr.bf16.mxu0 %v3079_v39  ;;  %v3176_v39 = vld [vmem:[%s3985_s21 + $0xb0] ss:$8 sps:$4 sm:$0xff]  }
 0x2d9   : > { %2096 = vmatpush1.bf16.msra.mxu1 %v3149_v6  ;;  %v1232_v6 = vsub.s32 1, %v4014_v50 }
 0x2da   : > { %2097 = vmatprep.subr.bf16.mxu1 %v3154_v7 }
 0x2db   : > { %1831 = vmatpush1.bf16.msra.mxu0 %v3077_v44  ;;  %v3181_v44 = vld [vmem:[%s3985_s21 + $0xc4] ss:$8 sps:$4 sm:$0xff]  }
 0x2dc   : > { %1832 = vmatprep.subr.bf16.mxu0 %v3085_v46  ;;  %v3182_v46 = vld [vmem:[%s3985_s21 + $0xd0] ss:$8 sps:$4 sm:$0xff]  }
 0x2dd   : > { %2098 = vmatpush1.bf16.msra.mxu1 %v3152_v9 }
 0x2de   : > { %2099 = vmatprep.subr.bf16.mxu1 %v3157_v10 }
 0x2df   : > { %1833 = vmatpush1.bf16.msra.mxu0 %v3083_v55  ;;  %v3185_v55 = vld [vmem:[%s3985_s21 + $0xe0] ss:$8 sps:$4 sm:$0xff]  }
 0x2e0   : > { %1834 = vmatprep.subr.bf16.mxu0 %v3091_v56  ;;  %v3190_v56 = vld [vmem:[%s3985_s21 + $0xf4] ss:$8 sps:$4 sm:$0xff]  }
 0x2e1   : > { %2100 = vmatpush1.bf16.msra.mxu1 %v3155_v57 }
 0x2e2   : > { %2101 = vmatprep.subr.bf16.mxu1 %v3160_v13 }
 0x2e3   : > { %1835 = vmatpush1.bf16.msra.mxu0 %v3089_v63 }
 0x2e4   : > { %1836 = vmatprep.subr.bf16.mxu0 %v3097_v0 }
 0x2e5   : > { %2102 = vmatpush1.bf16.msra.mxu1 %v3158_v16 }
 0x2e6   : > { %2103 = vmatprep.subr.bf16.mxu1 %v3163_v17 }
 0x2e7   : > { %1837 = vmatpush1.bf16.msra.mxu0 %v3095_v3 }
 0x2e8   : > { %1838 = vmatprep.subr.bf16.mxu0 %v3103_v5  ;;  %v1224_v5 = vld [vmem:[%s3983_s27] sm:$0x3] }
 0x2e9   : > { %2104 = vmatpush1.bf16.msra.mxu1 %v3161_v20  ;;  %v1229_v7 = vrot.slane %v1224_v5, %v1228_v4 }
 0x2ea   : > { %2105 = vmatprep.subr.bf16.mxu1 %v3166_v21 }
 0x2eb   : > { %1839 = vmatpush1.bf16.msra.mxu0 %v3101_v8  ;;  %v1233_v8 = vrot.slane %v1224_v5, %v1232_v6 }
 0x2ec   : > { %1840 = vmatprep.subr.bf16.mxu0 %v3109_v58 }
 0x2ed   : > { %2106 = vmatpush1.bf16.msra.mxu1 %v3164_v24 }
 0x2ee   : > { %2107 = vmatprep.subr.bf16.mxu1 %v3169_v25 }
 0x2ef   : > { %1841 = vmatpush1.bf16.msra.mxu0 %v3107_v11 }
 0x2f0   : > { %1842 = vmatprep.subr.bf16.mxu0 %v3115_v12 }
 0x2f1   : > { %2108 = vmatpush1.bf16.msra.mxu1 %v3167_v28 }
 0x2f2   : > { %2109 = vmatprep.subr.bf16.mxu1 %v3172_v29 }
 0x2f3   : > { %1843 = vmatpush1.bf16.msra.mxu0 %v3113_v14 }
 0x2f4   : > { %1844 = vmatprep.subr.bf16.mxu0 %v3121_v15 }
 0x2f5   : > { %2110 = vmatpush1.bf16.msra.mxu1 %v3170_v32 }
 0x2f6   : > { %2111 = vmatprep.subr.bf16.mxu1 %v3175_v33 }
 0x2f7   : > { %1845 = vmatpush1.bf16.msra.mxu0 %v3119_v18 }
 0x2f8   : > { %1846 = vmatprep.subr.bf16.mxu0 %v3127_v19 }
 0x2f9   : > { %2112 = vmatpush1.bf16.msra.mxu1 %v3173_v35 }
 0x2fa   : > { %2113 = vmatprep.subr.bf16.mxu1 %v3178_v36 }
 0x2fb   : > { %1847 = vmatpush1.bf16.msra.mxu0 %v3125_v22 }
 0x2fc   : > { %1848 = vmatprep.subr.bf16.mxu0 %v3133_v23 }
 0x2fd   : > { %2114 = vmatpush1.bf16.msra.mxu1 %v3176_v39 }
 0x2fe   : > { %2115 = vmatprep.subr.bf16.mxu1 %v3181_v44  ;;  %v1919_v44 = vld [vmem:[%s3991_s29] sm:$0x3] }
 0x2ff   : > { %1849 = vmatpush1.bf16.msra.mxu0 %v3131_v26 }
 0x300   : > { %1850 = vmatprep.subr.bf16.mxu0 %v3139_v27 }
 0x301   : > { %2116 = vmatpush1.bf16.msra.mxu1 %v3179_v41 }
 0x302   : > { %2117 = vmatprep.subr.bf16.mxu1 %v3184_v51  ;;  %v1928_v51 = vrot.slane %v1919_v44, %v1232_v6 }
 0x303   : > { %1851 = vmatpush1.bf16.msra.mxu0 %v3137_v30 }
 0x304   : > { %1852 = vmatprep.subr.bf16.mxu0 %v3142_v31 }
 0x305   : > { %2118 = vmatpush1.bf16.msra.mxu1 %v3182_v46  ;;  %v1924_v46 = vrot.slane %v1919_v44, %v1228_v4 }
 0x306   : > { %2119 = vmatprep.subr.bf16.mxu1 %v3187_v52 }
 0x307   : > { %1853 = vmatpush1.bf16.msra.mxu0 %v3140_v34 }
 0x309   : > { %2120 = vmatpush1.bf16.msra.mxu1 %v3185_v55 }
 0x30a   : > { %1855 = vmatmul.mubr.bf16.vlgmr.msra.gmra.mrb[0].mxu0 %v1120_v37  ;;  %2121 = vmatprep.subr.bf16.mxu1 %v3190_v56 }
 0x30b   : > { %1864 = vmatprep.mubr.bf16.mxu0 %v1127_v38 }
 0x30d   : > { %2122 = vmatpush1.bf16.msra.mxu1 %v3188_v59 }
 0x312   : > { %1865 = vmatmul.mubr.bf16.gmra.mrb[4].mxu0 %v1126_v40 }
 0x3a2   : > { %v1750_v60 = vpop.f32.mrb[0].mxu1 }
 0x3a3   : > { %v1752_v61 = vpop.f32.mrb[1].mxu1  ;;  %v1751_v58 = vadd.f32 %v1750_v60, %v1229_v7 }
 0x3a4   : > { %v1754_v62 = vpop.f32.mrb[2].mxu1  ;;  %v1753_v9 = vadd.f32 %v1752_v61, %v1233_v8 }
 0x3a5   : > { %v1756_v63 = vpop.f32.mrb[3].mxu1  ;;  %v1755_v11 = vadd.f32 %v1754_v62, %v1229_v7 }
 0x3a6   : > { %v1757_v13 = vadd.f32 %v1756_v63, %v1233_v8 }
 0x3aa   : > { %v1760_v0 = vpop.f32.mrb[4].mxu1 }
 0x3ab   : > { %v1762_v1 = vpop.f32.mrb[5].mxu1  ;;  %v1761_v21 = vadd.f32 %v1760_v0, %v1229_v7 }
 0x3ac   : > { %v1764_v2 = vpop.f32.mrb[6].mxu1  ;;  %v1763_v50 = vadd.f32 %v1762_v1, %v1233_v8 }
 0x3ad   : > { %v1766_v3 = vpop.f32.mrb[7].mxu1  ;;  %v1765_v27 = vadd.f32 %v1764_v2, %v1229_v7 }
 0x3ae   : > { %v1767_v30 = vadd.f32 %v1766_v3, %v1233_v8 }
 0x3dd   : > { %v1856_v10 = vpop.f32.mrb[0].mxu0 }
 0x3de   : > { %v2792_v12 = vadd.f32 %v1856_v10, %v1751_v58  ;;  %v1858_v57 = vpop.f32.mrb[1].mxu0 }
 0x3df   : > { %v2794_v14 = vadd.f32 %v1858_v57, %v1753_v9  ;;  %v1860_v15 = vpop.f32.mrb[2].mxu0 }
 0x3e0   : > { %v2796_v16 = vadd.f32 %v1860_v15, %v1755_v11  ;;  %v1862_v17 = vpop.f32.mrb[3].mxu0  ;;  %v1875_v19 = vmax.f32 %v2792_v12, 0.0  ;;  %v3191_v11 = vld [vmem:[#allocation16 + $0x40] sm:$0xff] (!%p2593_p0)   ;;  %v3198_v15 = vld [vmem:[#allocation16 + $0x18] sm:$0xff] (!%p2593_p0)  }
 0x3e1   : > { %v2798_v18 = vadd.f32 %v1862_v17, %v1757_v13  ;;  %v1876_v22 = vmax.f32 %v2794_v14, 0.0  ;;  %2747 = vmatprep.subr.bf16.mxu0 (!%p2593_p0), %v3191_v11  ;;  %2815 = vmatprep.subr.bf16.mxu1 (!%p2593_p0), %v3191_v11  ;;  %v3194_v13 = vld [vmem:[#allocation16 + $0x8] sm:$0xff] (!%p2593_p0)   ;;  %v3197_v14 = vld [vmem:[#allocation16 + $0x58] sm:$0xff] (!%p2593_p0)   ;;  %v3200_v17 = vld [vmem:[#allocation16 + $0x20] sm:$0xff] (!%p2593_p0)  }
 0x3e2   : > { %v1877_v20 = vmax.f32 %v2796_v16, 0.0  ;;  %v3199_v16 = vld [vmem:[#allocation16 + $0x60] sm:$0xff] (!%p2593_p0)  }
 0x3e3   : > { %v1878_v23 = vmax.f32 %v2798_v18, 0.0  ;;  %v3201_v18 = vld [vmem:[#allocation16 + $0x68] sm:$0xff] (!%p2593_p0)  }
 0x3e4   : > { %v1883_v24 = vpack.c.bf16 %v1877_v20, %v1875_v19  ;;  %v3202_v19 = vld [vmem:[#allocation16 + $0x28] sm:$0xff] (!%p2593_p0)   ;;  %v3203_v20 = vld [vmem:[#allocation16 + $0x70] sm:$0xff] (!%p2593_p0)  }
 0x3e5   : > { %v1884_v25 = vpack.c.bf16 %v1878_v23, %v1876_v22  ;;  %v1866_v26 = vpop.f32.mrb[4].mxu0  ;;  %v3205_v22 = vld [vmem:[#allocation16 + $0x78] sm:$0xff] (!%p2593_p0)  }
 0x3e6   : > { %v2800_v28 = vadd.f32 %v1866_v26, %v1761_v21  ;;  %v1868_v29 = vpop.f32.mrb[5].mxu0  ;;  %v3204_v21 = vld [vmem:[#allocation16 + $0x30] sm:$0xff] (!%p2593_p0)   ;;  %v3206_v23 = vld [vmem:[#allocation16 + $0x38] sm:$0xff] (!%p2593_p0)  }
 0x3e7   : > { %v2802_v31 = vadd.f32 %v1868_v29, %v1763_v50  ;;  %v1870_v32 = vpop.f32.mrb[6].mxu0  ;;  %2123 = vmatprep.mubr.bf16.mxu1 %v1884_v25 }
 0x3e8   : > { %v2804_v33 = vadd.f32 %v1870_v32, %v1765_v27  ;;  %v1872_v34 = vpop.f32.mrb[7].mxu0  ;;  %2124 = vmatmul.mubr.bf16.vlgmr.msra.gmra.mrb[8].mxu1 %v1883_v24  ;;  %v1879_v36 = vmax.f32 %v2800_v28, 0.0  ;;  %v2723_v27 = vld [vmem:[#allocation18] ss:$0 sm:$0xff] (!%p2593_p0) }
 0x3e9   : > { %v2806_v35 = vadd.f32 %v1872_v34, %v1767_v30  ;;  %v1880_v38 = vmax.f32 %v2802_v31, 0.0 }
 0x3ea   : > { %v1881_v37 = vmax.f32 %v2804_v33, 0.0 }
 0x3eb   : > { %v1882_v39 = vmax.f32 %v2806_v35, 0.0 }
 0x3ec   : > { %v1885_v40 = vpack.c.bf16 %v1881_v37, %v1879_v36 }
 0x3ed   : > { %v1886_v41 = vpack.c.bf16 %v1882_v39, %v1880_v38 }
 0x3ef   : > { %2133 = vmatprep.mubr.bf16.mxu1 %v1886_v41 }
 0x3f0   : > { %2134 = vmatmul.mubr.bf16.gmra.mrb[12].mxu1 %v1885_v40 }
 0x4bb   : > { %v2125_v52 = vpop.f32.mrb[8].mxu1 }
 0x4bc   : > { %v2126_v55 = vadd.f32 %v2125_v52, %v1924_v46  ;;  %v2127_v56 = vpop.f32.mrb[9].mxu1 }
 0x4bd   : > { %v2128_v59 = vadd.f32 %v2127_v56, %v1928_v51  ;;  %v2129_v60 = vpop.f32.mrb[10].mxu1 }
 0x4be   : > { %v4320_v61 = vadd.f32 %v2126_v55, %v4000_v42  ;;  %v2130_v62 = vadd.f32 %v2129_v60, %v1924_v46  ;;  %v2131_v63 = vpop.f32.mrb[11].mxu1 }
 0x4bf   : > { %v2145_v0 = vadd.f32 %v2128_v59, %v4004_v45  ;;  %v2132_v1 = vadd.f32 %v2131_v63, %v1928_v51 }
 0x4c0   : > { %2152 = vst [vmem:[#allocation2] sm:$0xff] %v4320_v61  ;;  %v4325_v2 = vadd.f32 %v2130_v62, %v4002_v43 }
 0x4c1   : > { %2153 = vst [vmem:[#allocation2 + $0x8] sm:$0xff] %v2145_v0  ;;  %v2147_v3 = vadd.f32 %v2132_v1, %v4008_v47 }
 0x4c2   : > { %2154 = vst [vmem:[#allocation2 + $0x10] sm:$0xff] %v4325_v2  ;;  %v2163_v50 = vpack.c.bf16 (!%p2593_p0), %v4325_v2, %v4320_v61 }
 0x4c3   : > { %2155 = vst [vmem:[#allocation2 + $0x18] sm:$0xff] %v2147_v3  ;;  %v2135_v4 = vpop.f32.mrb[12].mxu1  ;;  %v2164_v12 = vpack.c.bf16 (!%p2593_p0), %v2147_v3, %v2145_v0 }
 0x4c4   : > { %v2136_v5 = vadd.f32 %v2135_v4, %v1924_v46  ;;  %v2137_v42 = vpop.f32.mrb[13].mxu1 }
 0x4c5   : > { %v2138_v6 = vadd.f32 %v2137_v42, %v1928_v51  ;;  %v2139_v7 = vpop.f32.mrb[14].mxu1  ;;  %2162 = sbr.rel (%p2593_p0) target bundleno = 1474 (0x5c2), region = 120  ;;  %2334 = vmatprep.mubr.bf16.mxu0 (!%p2593_p0), %v2164_v12 }
 0x4c6   : > { %v4330_v8 = vadd.f32 %v2136_v5, %v4010_v48  ;;  %v2140_v45 = vadd.f32 %v2139_v7, %v1924_v46  ;;  %v2141_v58 = vpop.f32.mrb[15].mxu1  ;;  %v3192_v48 = vld [vmem:[#allocation16] sm:$0xff] (!%p2593_p0)  }
 0x4c7   : > { %v2149_v9 = vadd.f32 %v2138_v6, %v4020_v53  ;;  %v2142_v43 = vadd.f32 %v2141_v58, %v1928_v51  ;;  %v3193_v53 = vld [vmem:[#allocation16 + $0x48] sm:$0xff] (!%p2593_p0)   ;;  %2748 = vmatpush3.bf16.msra.mxu0 (!%p2593_p0), %v3192_v48  ;;  %2823 = vmatpush3.bf16.msra.mxu1 (!%p2593_p0), %v3192_v48 }
 0x4c8   : > { %2156 = vst [vmem:[#allocation2 + $0x20] sm:$0xff] %v4330_v8  ;;  %v2150_v47 = vadd.f32 %v2140_v45, %v4012_v49  ;;  %2749 = vmatprep.subr.bf16.mxu0 (!%p2593_p0), %v3193_v53  ;;  %2816 = vmatprep.subr.bf16.mxu1 (!%p2593_p0), %v3193_v53  ;;  %v3195_v49 = vld [vmem:[#allocation16 + $0x50] sm:$0xff] (!%p2593_p0)  }
 0x4c9   : > { %2157 = vst [vmem:[#allocation2 + $0x28] sm:$0xff] %v2149_v9  ;;  %v2151_v10 = vadd.f32 %v2142_v43, %v4022_v54  ;;  %v3196_v54 = vld [vmem:[#allocation16 + $0x10] sm:$0xff] (!%p2593_p0)  }
 0x4ca   : > { %2158 = vst [vmem:[#allocation2 + $0x30] sm:$0xff] %v2150_v47  ;;  %v2165_v24 = vpack.c.bf16 (!%p2593_p0), %v2150_v47, %v4330_v8 }
 0x4cb   : > { %2159 = vst [vmem:[#allocation2 + $0x38] sm:$0xff] %v2151_v10  ;;  %v2166_v57 = vpack.c.bf16 (!%p2593_p0), %v2151_v10, %v2149_v9  ;;  %2750 = vmatpush3.bf16.msra.mxu0 (!%p2593_p0), %v3194_v13  ;;  %2824 = vmatpush3.bf16.msra.mxu1 (!%p2593_p0), %v3194_v13 }
 0x4cc   : > { %2751 = vmatprep.subr.bf16.mxu0 %v3195_v49  ;;  %2817 = vmatprep.subr.bf16.mxu1 %v3195_v49 }
 0x4cd   : > { %2342 = vmatprep.mubr.bf16.mxu1 %v2166_v57 }
 0x4cf   : > { %2752 = vmatpush3.bf16.msra.mxu0 %v3196_v54  ;;  %2825 = vmatpush3.bf16.msra.mxu1 %v3196_v54 }
 0x4d0   : > { %2753 = vmatprep.subr.bf16.mxu0 %v3197_v14  ;;  %2818 = vmatprep.subr.bf16.mxu1 %v3197_v14 }
 0x4d3   : > { %2754 = vmatpush3.bf16.msra.mxu0 %v3198_v15  ;;  %2826 = vmatpush3.bf16.msra.mxu1 %v3198_v15 }
 0x4d4   : > { %2755 = vmatprep.subr.bf16.mxu0 %v3199_v16  ;;  %2819 = vmatprep.subr.bf16.mxu1 %v3199_v16 }
 0x4d7   : > { %2756 = vmatpush3.bf16.msra.mxu0 %v3200_v17  ;;  %2827 = vmatpush3.bf16.msra.mxu1 %v3200_v17 }
 0x4d8   : > { %2757 = vmatprep.subr.bf16.mxu0 %v3201_v18  ;;  %2820 = vmatprep.subr.bf16.mxu1 %v3201_v18 }
 0x4db   : > { %2758 = vmatpush3.bf16.msra.mxu0 %v3202_v19  ;;  %2828 = vmatpush3.bf16.msra.mxu1 %v3202_v19 }
 0x4dc   : > { %2759 = vmatprep.subr.bf16.mxu0 %v3203_v20  ;;  %2821 = vmatprep.subr.bf16.mxu1 %v3203_v20 }
 0x4df   : > { %2760 = vmatpush3.bf16.msra.mxu0 %v3204_v21  ;;  %2829 = vmatpush3.bf16.msra.mxu1 %v3204_v21 }
 0x4e0   : > { %2761 = vmatprep.subr.bf16.mxu0 %v3205_v22  ;;  %2822 = vmatprep.subr.bf16.mxu1 %v3205_v22 }
 0x4e3   : > { %2762 = vmatpush3.bf16.msra.mxu0 %v3206_v23  ;;  %2830 = vmatpush3.bf16.msra.mxu1 %v3206_v23 }
 0x4e6   : > { %2335 = vmatmul.mubr.bf16.vlgmr.msra.gmra.mrb[0].mxu0 %v2163_v50  ;;  %2343 = vmatmul.mubr.bf16.vlgmr.msra.gmra.mrb[0].mxu1 %v2165_v24 }
 0x5b9   : > { %v2763_v25 = vpop.f32.mrb[0].mxu0  ;;  %v2769_v26 = vpop.f32.mrb[0].mxu1 }
 0x5ba   : > { %v2764_v28 = vpop.f32.mrb[1].mxu0  ;;  %v2770_v29 = vpop.f32.mrb[1].mxu1 }
 0x5bb   : > { %v2765_v30 = vadd.f32 %v2764_v28, %v2763_v25  ;;  %v2771_v31 = vadd.f32 %v2770_v29, %v2769_v26  ;;  %v2766_v32 = vpop.f32.mrb[2].mxu0  ;;  %v2772_v33 = vpop.f32.mrb[2].mxu1 }
 0x5bc   : > { %v2767_v34 = vpop.f32.mrb[3].mxu0  ;;  %v2773_v35 = vpop.f32.mrb[3].mxu1 }
 0x5bd   : > { %v2337_v36 = vadd.f32 %v2765_v30, %v2723_v27  ;;  %v2345_v37 = vadd.f32 %v2771_v31, %v2723_v27  ;;  %v2768_v38 = vadd.f32 %v2767_v34, %v2766_v32  ;;  %v2774_v39 = vadd.f32 %v2773_v35, %v2772_v33 }
 0x5bf   : > { %2351 = vst [vmem:[#allocation19] sm:$0xff] %v2337_v36  ;;  %2353 = vst [vmem:[#allocation19 + $0x10] sm:$0xff] %v2345_v37  ;;  %v2340_v40 = vadd.f32 %v2768_v38, %v2723_v27  ;;  %v2348_v41 = vadd.f32 %v2774_v39, %v2723_v27 }
 0x5c1   : > { %2352 = vst [vmem:[#allocation19 + $0x8] sm:$0xff] %v2340_v40  ;;  %2354 = vst [vmem:[#allocation19 + $0x18] sm:$0xff] %v2348_v41 }
 0x5c2 PF: > { %p2906_p2 = scmp.eq.s32.totalorder %s3667_s17, 4  ;;  %s3583_s15 = smov [#allocation19]  }
 0x5c3   : > { %s2364_s5 = sshll.u32 %s3583_s15, 4  ;;  %s2365_s5 = int_to_ptr.vmem [resolvable:$true] %s2364_s5 }
 0x5c4   : > { %s3467_s30 = scalar_lea.vmem %s2365_s5, 512  ;;  %p3474_p3 = scmp.lt.s32.totalorder %s2365_s5, %s2365_s5 }
 0x5c5   : > { %p3468_p12 = scmp.ne.s32.totalorder %s2365_s5, %s3467_s30  ;;  %p3475_p8 = scmp.lt.s32.totalorder %s3467_s30, %s3467_s30 }
 0x5c7   : > { %p3469_p11 = pnand %p3468_p12, %p2906_p2  ;;  %p3476_p7 = por %p3475_p8, %p3474_p3 }
 0x5c9   : > { %p3470_p1 = pneg %p3469_p11 }
 0x5cb   : > { %p3477_p4 = pnand %p3476_p7, %p3470_p1 }
 0x5cd   : > { %3480 = shalt.err (!%p3477_p4)
}
 0x5ce   : > { %s4465_s12 = sld [smem:[#allocation36_spill]] }
 0x5d4   : > { %s4466_s23 = smov %s4465_s12  ;;  %s3481_s11 = scalar_lea.hbm %s4465_s12, 512 }
 0x5d5   : > { %p3482_p13 = scmp.ne.s32.totalorder %s4466_s23, %s3481_s11  ;;  %p3487_p9 = scmp.lt.u32.totalorder %s3481_s11, %s4466_s23 }
 0x5d7   : > { %p3483_p6 = pnand %p3482_p13, %p2906_p2 }
 0x5d9   : > { %p3484_p5 = pneg %p3483_p6 }
 0x5db   : > { %p3489_p10 = pnand %p3487_p9, %p3484_p5 }
 0x5dd   : > { %3492 = shalt.err (!%p3489_p10)
}
 0x5de   : > { %s3584_s27 = smov 128   ;;  %s3585_s14 = smov 8  }
 0x5df   : > { %2863 = dma.vmem_to_hbm [thread:$0]  (%p2906_p2), %s2365_s5, 512, %s4466_s23, [#allocation6], %s3584_s27, %s3584_s27, %s3585_s14  }
 0x5e0   : > { %3538 = dma.done.wait (%p2906_p2), [#allocation6], 512  }
 0x5e1   : > { %3540 = vsyncadd (%p2906_p2), [#allocation6], 4294966784 }
 0x5e2 PF: > { %s4467_s19 = sld [smem:[#allocation28_spill]]  ;;  %s4468_s9 = sld [smem:[#allocation26_spill]] }
 0x5e3   : > { %s4469_s11 = sld [smem:[#allocation31_spill]]  ;;  %s4470_s1 = sld [smem:[#allocation29_spill]] }
 0x5e4   : > { %s4471_s30 = smov %s3547_s10  ;;  %s4473_s12 = smov %s3559_s13 }
 0x5e8   : > { %s29_s14 = sadd.s32 1, %s4467_s19   ;;  %s4472_s10 = smov %s4468_s9 }
 0x5e9   : > { %p26_p0 = scmp.ge.s32.totalorder %s29_s14, 7   ;;  %s4474_s13 = smov %s4470_s1 }
 0x5eb   :  { %28 = sbr.rel (!%p26_p0) target bundleno = 16 (0x10), region = 179 }
 0x5f2   :  { %2380 = vsyncpa [#allocation5], 1 }
 0x5f3   :  { %2382 = vsyncpa [#allocation5 + $0x1], 1 }
 0x5f4   :  { %2383 = vsyncpa [#allocation8], 1 }
 0x5f5   :  { %2384 = vsyncpa [#allocation11], 1 }
 0x5f6   :  { %2386 = vsyncpa [#allocation11 + $0x1], 1 }
 0x5f7   :  { %2387 = vsyncpa [#allocation14], 1 }
 0x5f8   :  { %2389 = vsyncpa [#allocation14 + $0x1], 1 }
 0x5f9   :  { %2390 = vsyncpa [#allocation17], 1 }
 0x5fa   :  { %2391 = vsyncpa [#allocation6], 1 }
 0x5fb   :  { %2393 = vsyncpa [#allocation6 + $0x1], 1 }

</bundles_post_ra>
